<compile_context>
chip_gen: v6e
topology: v6e:2x2x1
jax: 0.10.0
libtpu: 0.0.40
codegen_flags: <defaults>
</compile_context>

<pallas_src>
import jax
import jax.numpy as jnp
import numpy as np
from jax.experimental import pallas as pl
from jax.experimental.pallas import tpu as pltpu


# ----------------------------------------------------------------------------
# Kernel 1: input projection for ALL timesteps (parallel, off the serial path)
#   gi_g = x2d @ W_ih[g] + b   for g in {r, z, n},  x2d: (T*B, E)
#   b_hh[r], b_hh[z] are folded in here; b_ih[n] only for the n gate.
# ----------------------------------------------------------------------------
def _input_proj_kernel(x_ref, wih_ref, bih_ref, bhh_ref,
                       gr_ref, gz_ref, gn_ref):
    x = x_ref[...]                                               # (T*B, E)
    gr_ref[...] = (jnp.dot(x, wih_ref[0], preferred_element_type=jnp.float32)
                   + (bih_ref[0] + bhh_ref[0]))
    gz_ref[...] = (jnp.dot(x, wih_ref[1], preferred_element_type=jnp.float32)
                   + (bih_ref[1] + bhh_ref[1]))
    gn_ref[...] = (jnp.dot(x, wih_ref[2], preferred_element_type=jnp.float32)
                   + bih_ref[2])


# ----------------------------------------------------------------------------
# Kernel 2: sequential GRU recurrence, single invocation, loop inside kernel.
#   Inputs gi_* are time-major (T, B, H); only gh = h @ W_hh is on the
#   serial path.  Emits all hidden states (T, B, H) plus the final state.
# ----------------------------------------------------------------------------
def _gru_recurrence_kernel(gr_ref, gz_ref, gn_ref, h0_ref, whh_ref, bhn_ref,
                           hall_ref, hT_ref):
    T, B, H = gr_ref.shape

    # Hoist loop-invariant loads / broadcasts out of the recurrence.
    w_hr = whh_ref[0]                                            # (H, H)
    w_hz = whh_ref[1]
    w_hn = whh_ref[2]
    b_hn = jnp.broadcast_to(bhn_ref[...], (B, H))                # (B, H)

    def step(t, h):
        gh_r = jnp.dot(h, w_hr, preferred_element_type=jnp.float32)
        gh_z = jnp.dot(h, w_hz, preferred_element_type=jnp.float32)
        gh_n = jnp.dot(h, w_hn, preferred_element_type=jnp.float32) + b_hn
        r = jax.nn.sigmoid(gr_ref[t] + gh_r)
        z = jax.nn.sigmoid(gz_ref[t] + gh_z)
        n = jnp.tanh(gn_ref[t] + r * gh_n)
        h_new = (1.0 - z) * n + z * h
        hall_ref[t] = h_new.astype(hall_ref.dtype)
        return h_new

    h_final = jax.lax.fori_loop(0, T, step,
                                h0_ref[...].astype(jnp.float32),
                                unroll=(T <= 32))
    hT_ref[...] = h_final.astype(hT_ref.dtype)


# ----------------------------------------------------------------------------
# Kernel 3: output projection, parallel grid tiled over the vocab axis.
#   logits = h2d @ W_out + b_out,  h2d: (T*B, H)
# ----------------------------------------------------------------------------
def _output_proj_kernel(h_ref, w_ref, b_ref, o_ref):
    o_ref[...] = (jnp.dot(h_ref[...], w_ref[...],
                          preferred_element_type=jnp.float32)
                  + b_ref[...]).astype(o_ref.dtype)


@jax.jit
def _decoder_pallas(x_tbe, h0, w_ih, w_hh, b_ih, b_hh, w_out_t, b_out):
    T, B, E = x_tbe.shape
    H = h0.shape[-1]
    V = w_out_t.shape[-1]
    M = T * B

    # --- 1) input projection for all timesteps (one parallel matmul/gate) ---
    x2d = x_tbe.reshape(M, E)
    gi_r, gi_z, gi_n = pl.pallas_call(
        _input_proj_kernel,
        out_shape=(jax.ShapeDtypeStruct((M, H), jnp.float32),) * 3,
    )(x2d, w_ih, b_ih, b_hh)

    # --- 2) sequential GRU recurrence (single kernel invocation) ---
    h_all, h_T = pl.pallas_call(
        _gru_recurrence_kernel,
        out_shape=(jax.ShapeDtypeStruct((T, B, H), jnp.float32),
                   jax.ShapeDtypeStruct((B, H), jnp.float32)),
    )(gi_r.reshape(T, B, H), gi_z.reshape(T, B, H), gi_n.reshape(T, B, H),
      h0, w_hh, b_hh[2])

    # --- 3) output projection, tiled & parallel over the vocab axis ---
    if V % 512 == 0:
        TV = 512
    elif V % 256 == 0:
        TV = 256
    elif V % 128 == 0:
        TV = 128
    else:
        TV = V                      # small vocab: single full-V tile
    logits2d = pl.pallas_call(
        _output_proj_kernel,
        out_shape=jax.ShapeDtypeStruct((M, V), jnp.float32),
        grid=(V // TV,),
        in_specs=[
            pl.BlockSpec((M, H), lambda j: (0, 0)),     # hidden states (resident)
            pl.BlockSpec((H, TV), lambda j: (0, j)),    # W_out tile
            pl.BlockSpec((1, TV), lambda j: (0, j)),    # b_out tile
        ],
        out_specs=pl.BlockSpec((M, TV), lambda j: (0, j)),
        compiler_params=pltpu.CompilerParams(
            dimension_semantics=("parallel",)),
    )(h_all.reshape(M, H), w_out_t, b_out)

    logits_btv = logits2d.reshape(T, B, V).transpose(1, 0, 2)    # (B, T, V)
    return logits_btv, h_T


class DecoderPallas:
    """JAX/Pallas port of the PyTorch Decoder (emb -> GRU -> Linear)."""

    def __init__(self, vocab_size, emb_dim, hidden_dim, pad_idx, key):
        self.vocab_size = vocab_size
        self.emb_dim = emb_dim
        self.hidden_dim = hidden_dim
        self.pad_idx = pad_idx

        ks = jax.random.split(key, 7)
        scale = 1.0 / np.sqrt(hidden_dim)

        emb = jax.random.normal(ks[0], (vocab_size, emb_dim), jnp.float32)
        self.emb = emb.at[pad_idx].set(0.0)          # padding_idx row is zero

        # Per-gate layout, PyTorch GRU gate order [r, z, n]:
        #   w_ih[g]: (E, H), w_hh[g]: (H, H), biases (1, H) per gate.
        self.w_ih = jax.random.uniform(ks[1], (3, emb_dim, hidden_dim),
                                       jnp.float32, -scale, scale)
        self.w_hh = jax.random.uniform(ks[2], (3, hidden_dim, hidden_dim),
                                       jnp.float32, -scale, scale)
        self.b_ih = jax.random.uniform(ks[3], (3, 1, hidden_dim),
                                       jnp.float32, -scale, scale)
        self.b_hh = jax.random.uniform(ks[4], (3, 1, hidden_dim),
                                       jnp.float32, -scale, scale)

        # nn.Linear(hidden_dim, vocab_size) stored transposed: (H, V), (1, V)
        self.w_out_t = jax.random.uniform(ks[5], (hidden_dim, vocab_size),
                                          jnp.float32, -scale, scale)
        self.b_out = jax.random.uniform(ks[6], (1, vocab_size),
                                        jnp.float32, -scale, scale)

    def __call__(self, index, state):
        # index: (B, T) or (B,) int32 ; state: (1, B, H)
        embedding = self.emb[index]                   # gather (plain-JAX glue)
        if embedding.ndim == 2:                       # torch.unsqueeze(emb, 1)
            embedding = embedding[:, None, :]
        x_tbe = jnp.transpose(embedding, (1, 0, 2))   # (T, B, E) time-major
        h0 = state[0]                                 # (B, H)

        logits_btv, h_T = _decoder_pallas(
            x_tbe, h0, self.w_ih, self.w_hh, self.b_ih, self.b_hh,
            self.w_out_t, self.b_out)
        return logits_btv, h_T[None]                  # (B,T,V), (1,B,H)


def _reference_decoder(dec, index, state):
    """Pure-JAX reference of the same forward pass (for validation)."""
    embedding = dec.emb[index]
    if embedding.ndim == 2:
        embedding = embedding[:, None, :]
    h = state[0]
    outs = []
    for t in range(embedding.shape[1]):
        x = embedding[:, t, :]
        r = jax.nn.sigmoid(x @ dec.w_ih[0] + dec.b_ih[0]
                           + h @ dec.w_hh[0] + dec.b_hh[0])
        z = jax.nn.sigmoid(x @ dec.w_ih[1] + dec.b_ih[1]
                           + h @ dec.w_hh[1] + dec.b_hh[1])
        n = jnp.tanh(x @ dec.w_ih[2] + dec.b_ih[2]
                     + r * (h @ dec.w_hh[2] + dec.b_hh[2]))
        h = (1.0 - z) * n + z * h
        outs.append(h @ dec.w_out_t + dec.b_out)
    return jnp.stack(outs, axis=1), h[None]


if __name__ == "__main__":
    vocab_size, emb_dim, hidden_dim, pad_idx = 64, 32, 32, 0
    B, T = 2, 8

    key = jax.random.PRNGKey(0)
    k_param, k_idx, k_state = jax.random.split(key, 3)

    dec = DecoderPallas(vocab_size, emb_dim, hidden_dim, pad_idx, k_param)

    index = jax.random.randint(k_idx, (B, T), 0, vocab_size, dtype=jnp.int32)
    state = jax.random.normal(k_state, (1, B, hidden_dim), jnp.float32)

    output, new_state = dec(index, state)
    output = jax.block_until_ready(output)
    new_state = jax.block_until_ready(new_state)

    ref_out, ref_state = _reference_decoder(dec, index, state)
    np.testing.assert_allclose(np.asarray(output), np.asarray(ref_out),
                               rtol=1e-4, atol=1e-4)
    np.testing.assert_allclose(np.asarray(new_state), np.asarray(ref_state),
                               rtol=1e-4, atol=1e-4)

    print("KERNEL_OK")
</pallas_src>

<mosaic_0001>
module attributes {stable_mosaic.version = 11 : i64} {
  func.func @_output_proj_kernel(%arg0: i32, %arg1: memref<16x32xf32, #tpu.memory_space<vmem>>, %arg2: memref<32x64xf32, #tpu.memory_space<vmem>>, %arg3: memref<1x64xf32, #tpu.memory_space<vmem>>, %arg4: memref<16x64xf32, #tpu.memory_space<vmem>>) attributes {dimension_semantics = [#tpu.dimension_semantics<parallel>], iteration_bounds = array<i64: 1>, scalar_prefetch = 0 : i64, scratch_operands = 0 : i64, tpu.core_type = #tpu.core_type<tc>, window_params = [{pipeline_mode = #tpu.pipeline_mode<synchronous>, transform_indices = @transform_0, window_bounds = array<i64: 16, 32>}, {transform_indices = @transform_1, window_bounds = array<i64: 32, 64>}, {transform_indices = @transform_2, window_bounds = array<i64: 1, 64>}, {transform_indices = @transform_3, window_bounds = array<i64: 16, 64>}]} {
    %c0 = arith.constant 0 : index
    %c0_0 = arith.constant 0 : index
    %0 = vector.load %arg1[%c0, %c0_0] : memref<16x32xf32, #tpu.memory_space<vmem>>, vector<16x32xf32>
    %c0_1 = arith.constant 0 : index
    %c0_2 = arith.constant 0 : index
    %1 = vector.load %arg2[%c0_1, %c0_2] : memref<32x64xf32, #tpu.memory_space<vmem>>, vector<32x64xf32>
    %cst = arith.constant dense<0.000000e+00> : vector<16x64xf32>
    %2 = tpu.matmul %0, %1, %cst {dimension_numbers = #tpu.dot_dimension_numbers<[1], [0], [0], [1], [0, 0, 1, 1], [], []>} : vector<16x32xf32>, vector<32x64xf32>, vector<16x64xf32> -> vector<16x64xf32>
    %c0_3 = arith.constant 0 : index
    %c0_4 = arith.constant 0 : index
    %3 = vector.load %arg3[%c0_3, %c0_4] : memref<1x64xf32, #tpu.memory_space<vmem>>, vector<1x64xf32>
    %4 = vector.broadcast %3 : vector<1x64xf32> to vector<16x64xf32>
    %5 = arith.addf %2, %4 : vector<16x64xf32>
    %c0_5 = arith.constant 0 : index
    %c0_6 = arith.constant 0 : index
    %6 = vector.load %arg4[%c0_5, %c0_6] : memref<16x64xf32, #tpu.memory_space<vmem>>, vector<16x64xf32>
    tpu.vector_store %arg4[%c0_5, %c0_6], %5 {strides = array<i32>} : memref<16x64xf32, #tpu.memory_space<vmem>>, vector<16x64xf32>,
    return
  }
  func.func @transform_0(%arg0: i32) -> (i32, i32) {
    %c0_i32 = arith.constant 0 : i32
    %c0_i32_0 = arith.constant 0 : i32
    %c0_i32_1 = arith.constant 0 : i32
    return %c0_i32, %c0_i32_0 : i32, i32
  }
  func.func @transform_1(%arg0: i32) -> (i32, i32) {
    %c0_i32 = arith.constant 0 : i32
    %c0_i32_0 = arith.constant 0 : i32
    return %c0_i32, %arg0 : i32, i32
  }
  func.func @transform_2(%arg0: i32) -> (i32, i32) {
    %c0_i32 = arith.constant 0 : i32
    %c0_i32_0 = arith.constant 0 : i32
    return %c0_i32, %arg0 : i32, i32
  }
  func.func @transform_3(%arg0: i32) -> (i32, i32) {
    %c0_i32 = arith.constant 0 : i32
    %c0_i32_0 = arith.constant 0 : i32
    return %c0_i32, %arg0 : i32, i32
  }
}

module attributes {stable_mosaic.version = 11 : i64} {
  func.func @_gru_recurrence_kernel(%arg0: memref<8x2x32xf32, #tpu.memory_space<vmem>>, %arg1: memref<8x2x32xf32, #tpu.memory_space<vmem>>, %arg2: memref<8x2x32xf32, #tpu.memory_space<vmem>>, %arg3: memref<2x32xf32, #tpu.memory_space<vmem>>, %arg4: memref<3x32x32xf32, #tpu.memory_space<vmem>>, %arg5: memref<1x32xf32, #tpu.memory_space<vmem>>, %arg6: memref<8x2x32xf32, #tpu.memory_space<vmem>>, %arg7: memref<2x32xf32, #tpu.memory_space<vmem>>) attributes {dimension_semantics = [], scalar_prefetch = 0 : i64, scratch_operands = 0 : i64, tpu.core_type = #tpu.core_type<tc>} {
    %c0 = arith.constant 0 : index
    %c0_0 = arith.constant 0 : index
    %c0_1 = arith.constant 0 : index
    %0 = vector.load %arg4[%c0, %c0_0, %c0_1] : memref<3x32x32xf32, #tpu.memory_space<vmem>>, vector<1x32x32xf32>
    %1 = vector.shape_cast %0 : vector<1x32x32xf32> to vector<32x32xf32>
    %c1 = arith.constant 1 : index
    %c0_2 = arith.constant 0 : index
    %c0_3 = arith.constant 0 : index
    %2 = vector.load %arg4[%c1, %c0_2, %c0_3] : memref<3x32x32xf32, #tpu.memory_space<vmem>>, vector<1x32x32xf32>
    %3 = vector.shape_cast %2 : vector<1x32x32xf32> to vector<32x32xf32>
    %c2 = arith.constant 2 : index
    %c0_4 = arith.constant 0 : index
    %c0_5 = arith.constant 0 : index
    %4 = vector.load %arg4[%c2, %c0_4, %c0_5] : memref<3x32x32xf32, #tpu.memory_space<vmem>>, vector<1x32x32xf32>
    %5 = vector.shape_cast %4 : vector<1x32x32xf32> to vector<32x32xf32>
    %c0_6 = arith.constant 0 : index
    %c0_7 = arith.constant 0 : index
    %6 = vector.load %arg5[%c0_6, %c0_7] : memref<1x32xf32, #tpu.memory_space<vmem>>, vector<1x32xf32>
    %7 = vector.shape_cast %6 : vector<1x32xf32> to vector<1x32xf32>
    %8 = vector.broadcast %7 : vector<1x32xf32> to vector<2x32xf32>
    %c0_8 = arith.constant 0 : index
    %c0_9 = arith.constant 0 : index
    %9 = vector.load %arg3[%c0_8, %c0_9] : memref<2x32xf32, #tpu.memory_space<vmem>>, vector<2x32xf32>
    %c0_i32 = arith.constant 0 : i32
    %cst = arith.constant dense<0.000000e+00> : vector<2x32xf32>
    %10 = tpu.matmul %9, %1, %cst {dimension_numbers = #tpu.dot_dimension_numbers<[1], [0], [0], [1], [0, 0, 1, 1], [], []>} : vector<2x32xf32>, vector<32x32xf32>, vector<2x32xf32> -> vector<2x32xf32>
    %cst_10 = arith.constant dense<0.000000e+00> : vector<2x32xf32>
    %11 = tpu.matmul %9, %3, %cst_10 {dimension_numbers = #tpu.dot_dimension_numbers<[1], [0], [0], [1], [0, 0, 1, 1], [], []>} : vector<2x32xf32>, vector<32x32xf32>, vector<2x32xf32> -> vector<2x32xf32>
    %cst_11 = arith.constant dense<0.000000e+00> : vector<2x32xf32>
    %12 = tpu.matmul %9, %5, %cst_11 {dimension_numbers = #tpu.dot_dimension_numbers<[1], [0], [0], [1], [0, 0, 1, 1], [], []>} : vector<2x32xf32>, vector<32x32xf32>, vector<2x32xf32> -> vector<2x32xf32>
    %13 = arith.addf %12, %8 : vector<2x32xf32>
    %14 = arith.index_cast %c0_i32 : i32 to index
    %c0_12 = arith.constant 0 : index
    %c0_13 = arith.constant 0 : index
    %15 = vector.load %arg0[%14, %c0_12, %c0_13] : memref<8x2x32xf32, #tpu.memory_space<vmem>>, vector<1x2x32xf32>
    %16 = vector.shape_cast %15 : vector<1x2x32xf32> to vector<2x32xf32>
    %17 = arith.addf %16, %10 : vector<2x32xf32>
    %18 = arith.negf %17 : vector<2x32xf32>
    %19 = math.exp %18 : vector<2x32xf32>
    %cst_14 = arith.constant 1.000000e+00 : f32
    %20 = vector.broadcast %cst_14 : f32 to vector<2x32xf32>
    %21 = arith.addf %20, %19 : vector<2x32xf32>
    %22 = arith.divf %20, %21 : vector<2x32xf32>
    %23 = arith.index_cast %c0_i32 : i32 to index
    %c0_15 = arith.constant 0 : index
    %c0_16 = arith.constant 0 : index
    %24 = vector.load %arg1[%23, %c0_15, %c0_16] : memref<8x2x32xf32, #tpu.memory_space<vmem>>, vector<1x2x32xf32>
    %25 = vector.shape_cast %24 : vector<1x2x32xf32> to vector<2x32xf32>
    %26 = arith.addf %25, %11 : vector<2x32xf32>
    %27 = arith.negf %26 : vector<2x32xf32>
    %28 = math.exp %27 : vector<2x32xf32>
    %cst_17 = arith.constant 1.000000e+00 : f32
    %29 = vector.broadcast %cst_17 : f32 to vector<2x32xf32>
    %30 = arith.addf %29, %28 : vector<2x32xf32>
    %31 = arith.divf %29, %30 : vector<2x32xf32>
    %32 = arith.index_cast %c0_i32 : i32 to index
    %c0_18 = arith.constant 0 : index
    %c0_19 = arith.constant 0 : index
    %33 = vector.load %arg2[%32, %c0_18, %c0_19] : memref<8x2x32xf32, #tpu.memory_space<vmem>>, vector<1x2x32xf32>
    %34 = vector.shape_cast %33 : vector<1x2x32xf32> to vector<2x32xf32>
    %35 = arith.mulf %22, %13 : vector<2x32xf32>
    %36 = arith.addf %34, %35 : vector<2x32xf32>
    %37 = math.tanh %36 : vector<2x32xf32>
    %cst_20 = arith.constant 1.000000e+00 : f32
    %38 = vector.broadcast %cst_20 : f32 to vector<2x32xf32>
    %39 = arith.subf %38, %31 : vector<2x32xf32>
    %40 = arith.mulf %39, %37 : vector<2x32xf32>
    %41 = arith.mulf %31, %9 : vector<2x32xf32>
    %42 = arith.addf %40, %41 : vector<2x32xf32>
    %43 = arith.index_cast %c0_i32 : i32 to index
    %c0_21 = arith.constant 0 : index
    %c0_22 = arith.constant 0 : index
    %44 = vector.load %arg6[%43, %c0_21, %c0_22] : memref<8x2x32xf32, #tpu.memory_space<vmem>>, vector<1x2x32xf32>
    %45 = vector.shape_cast %44 : vector<1x2x32xf32> to vector<2x32xf32>
    %46 = vector.shape_cast %42 : vector<2x32xf32> to vector<1x2x32xf32>
    tpu.vector_store %arg6[%43, %c0_21, %c0_22], %46 {strides = array<i32>} : memref<8x2x32xf32, #tpu.memory_space<vmem>>, vector<1x2x32xf32>,
    %c1_i32 = arith.constant 1 : i32
    %cst_23 = arith.constant dense<0.000000e+00> : vector<2x32xf32>
    %47 = tpu.matmul %42, %1, %cst_23 {dimension_numbers = #tpu.dot_dimension_numbers<[1], [0], [0], [1], [0, 0, 1, 1], [], []>} : vector<2x32xf32>, vector<32x32xf32>, vector<2x32xf32> -> vector<2x32xf32>
    %cst_24 = arith.constant dense<0.000000e+00> : vector<2x32xf32>
    %48 = tpu.matmul %42, %3, %cst_24 {dimension_numbers = #tpu.dot_dimension_numbers<[1], [0], [0], [1], [0, 0, 1, 1], [], []>} : vector<2x32xf32>, vector<32x32xf32>, vector<2x32xf32> -> vector<2x32xf32>
    %cst_25 = arith.constant dense<0.000000e+00> : vector<2x32xf32>
    %49 = tpu.matmul %42, %5, %cst_25 {dimension_numbers = #tpu.dot_dimension_numbers<[1], [0], [0], [1], [0, 0, 1, 1], [], []>} : vector<2x32xf32>, vector<32x32xf32>, vector<2x32xf32> -> vector<2x32xf32>
    %50 = arith.addf %49, %8 : vector<2x32xf32>
    %51 = arith.index_cast %c1_i32 : i32 to index
    %c0_26 = arith.constant 0 : index
    %c0_27 = arith.constant 0 : index
    %52 = vector.load %arg0[%51, %c0_26, %c0_27] : memref<8x2x32xf32, #tpu.memory_space<vmem>>, vector<1x2x32xf32>
    %53 = vector.shape_cast %52 : vector<1x2x32xf32> to vector<2x32xf32>
    %54 = arith.addf %53, %47 : vector<2x32xf32>
    %55 = arith.negf %54 : vector<2x32xf32>
    %56 = math.exp %55 : vector<2x32xf32>
    %cst_28 = arith.constant 1.000000e+00 : f32
    %57 = vector.broadcast %cst_28 : f32 to vector<2x32xf32>
    %58 = arith.addf %57, %56 : vector<2x32xf32>
    %59 = arith.divf %57, %58 : vector<2x32xf32>
    %60 = arith.index_cast %c1_i32 : i32 to index
    %c0_29 = arith.constant 0 : index
    %c0_30 = arith.constant 0 : index
    %61 = vector.load %arg1[%60, %c0_29, %c0_30] : memref<8x2x32xf32, #tpu.memory_space<vmem>>, vector<1x2x32xf32>
    %62 = vector.shape_cast %61 : vector<1x2x32xf32> to vector<2x32xf32>
    %63 = arith.addf %62, %48 : vector<2x32xf32>
    %64 = arith.negf %63 : vector<2x32xf32>
    %65 = math.exp %64 : vector<2x32xf32>
    %cst_31 = arith.constant 1.000000e+00 : f32
    %66 = vector.broadcast %cst_31 : f32 to vector<2x32xf32>
    %67 = arith.addf %66, %65 : vector<2x32xf32>
    %68 = arith.divf %66, %67 : vector<2x32xf32>
    %69 = arith.index_cast %c1_i32 : i32 to index
    %c0_32 = arith.constant 0 : index
    %c0_33 = arith.constant 0 : index
    %70 = vector.load %arg2[%69, %c0_32, %c0_33] : memref<8x2x32xf32, #tpu.memory_space<vmem>>, vector<1x2x32xf32>
    %71 = vector.shape_cast %70 : vector<1x2x32xf32> to vector<2x32xf32>
    %72 = arith.mulf %59, %50 : vector<2x32xf32>
    %73 = arith.addf %71, %72 : vector<2x32xf32>
    %74 = math.tanh %73 : vector<2x32xf32>
    %cst_34 = arith.constant 1.000000e+00 : f32
    %75 = vector.broadcast %cst_34 : f32 to vector<2x32xf32>
    %76 = arith.subf %75, %68 : vector<2x32xf32>
    %77 = arith.mulf %76, %74 : vector<2x32xf32>
    %78 = arith.mulf %68, %42 : vector<2x32xf32>
    %79 = arith.addf %77, %78 : vector<2x32xf32>
    %80 = arith.index_cast %c1_i32 : i32 to index
    %c0_35 = arith.constant 0 : index
    %c0_36 = arith.constant 0 : index
    %81 = vector.load %arg6[%80, %c0_35, %c0_36] : memref<8x2x32xf32, #tpu.memory_space<vmem>>, vector<1x2x32xf32>
    %82 = vector.shape_cast %81 : vector<1x2x32xf32> to vector<2x32xf32>
    %83 = vector.shape_cast %79 : vector<2x32xf32> to vector<1x2x32xf32>
    tpu.vector_store %arg6[%80, %c0_35, %c0_36], %83 {strides = array<i32>} : memref<8x2x32xf32, #tpu.memory_space<vmem>>, vector<1x2x32xf32>,
    %c2_i32 = arith.constant 2 : i32
    %cst_37 = arith.constant dense<0.000000e+00> : vector<2x32xf32>
    %84 = tpu.matmul %79, %1, %cst_37 {dimension_numbers = #tpu.dot_dimension_numbers<[1], [0], [0], [1], [0, 0, 1, 1], [], []>} : vector<2x32xf32>, vector<32x32xf32>, vector<2x32xf32> -> vector<2x32xf32>
    %cst_38 = arith.constant dense<0.000000e+00> : vector<2x32xf32>
    %85 = tpu.matmul %79, %3, %cst_38 {dimension_numbers = #tpu.dot_dimension_numbers<[1], [0], [0], [1], [0, 0, 1, 1], [], []>} : vector<2x32xf32>, vector<32x32xf32>, vector<2x32xf32> -> vector<2x32xf32>
    %cst_39 = arith.constant dense<0.000000e+00> : vector<2x32xf32>
    %86 = tpu.matmul %79, %5, %cst_39 {dimension_numbers = #tpu.dot_dimension_numbers<[1], [0], [0], [1], [0, 0, 1, 1], [], []>} : vector<2x32xf32>, vector<32x32xf32>, vector<2x32xf32> -> vector<2x32xf32>
    %87 = arith.addf %86, %8 : vector<2x32xf32>
    %88 = arith.index_cast %c2_i32 : i32 to index
    %c0_40 = arith.constant 0 : index
    %c0_41 = arith.constant 0 : index
    %89 = vector.load %arg0[%88, %c0_40, %c0_41] : memref<8x2x32xf32, #tpu.memory_space<vmem>>, vector<1x2x32xf32>
    %90 = vector.shape_cast %89 : vector<1x2x32xf32> to vector<2x32xf32>
    %91 = arith.addf %90, %84 : vector<2x32xf32>
    %92 = arith.negf %91 : vector<2x32xf32>
    %93 = math.exp %92 : vector<2x32xf32>
    %cst_42 = arith.constant 1.000000e+00 : f32
    %94 = vector.broadcast %cst_42 : f32 to vector<2x32xf32>
    %95 = arith.addf %94, %93 : vector<2x32xf32>
    %96 = arith.divf %94, %95 : vector<2x32xf32>
    %97 = arith.index_cast %c2_i32 : i32 to index
    %c0_43 = arith.constant 0 : index
    %c0_44 = arith.constant 0 : index
    %98 = vector.load %arg1[%97, %c0_43, %c0_44] : memref<8x2x32xf32, #tpu.memory_space<vmem>>, vector<1x2x32xf32>
    %99 = vector.shape_cast %98 : vector<1x2x32xf32> to vector<2x32xf32>
    %100 = arith.addf %99, %85 : vector<2x32xf32>
    %101 = arith.negf %100 : vector<2x32xf32>
    %102 = math.exp %101 : vector<2x32xf32>
    %cst_45 = arith.constant 1.000000e+00 : f32
    %103 = vector.broadcast %cst_45 : f32 to vector<2x32xf32>
    %104 = arith.addf %103, %102 : vector<2x32xf32>
    %105 = arith.divf %103, %104 : vector<2x32xf32>
    %106 = arith.index_cast %c2_i32 : i32 to index
    %c0_46 = arith.constant 0 : index
    %c0_47 = arith.constant 0 : index
    %107 = vector.load %arg2[%106, %c0_46, %c0_47] : memref<8x2x32xf32, #tpu.memory_space<vmem>>, vector<1x2x32xf32>
    %108 = vector.shape_cast %107 : vector<1x2x32xf32> to vector<2x32xf32>
    %109 = arith.mulf %96, %87 : vector<2x32xf32>
    %110 = arith.addf %108, %109 : vector<2x32xf32>
    %111 = math.tanh %110 : vector<2x32xf32>
    %cst_48 = arith.constant 1.000000e+00 : f32
    %112 = vector.broadcast %cst_48 : f32 to vector<2x32xf32>
    %113 = arith.subf %112, %105 : vector<2x32xf32>
    %114 = arith.mulf %113, %111 : vector<2x32xf32>
    %115 = arith.mulf %105, %79 : vector<2x32xf32>
    %116 = arith.addf %114, %115 : vector<2x32xf32>
    %117 = arith.index_cast %c2_i32 : i32 to index
    %c0_49 = arith.constant 0 : index
    %c0_50 = arith.constant 0 : index
    %118 = vector.load %arg6[%117, %c0_49, %c0_50] : memref<8x2x32xf32, #tpu.memory_space<vmem>>, vector<1x2x32xf32>
    %119 = vector.shape_cast %118 : vector<1x2x32xf32> to vector<2x32xf32>
    %120 = vector.shape_cast %116 : vector<2x32xf32> to vector<1x2x32xf32>
    tpu.vector_store %arg6[%117, %c0_49, %c0_50], %120 {strides = array<i32>} : memref<8x2x32xf32, #tpu.memory_space<vmem>>, vector<1x2x32xf32>,
    %c3_i32 = arith.constant 3 : i32
    %cst_51 = arith.constant dense<0.000000e+00> : vector<2x32xf32>
    %121 = tpu.matmul %116, %1, %cst_51 {dimension_numbers = #tpu.dot_dimension_numbers<[1], [0], [0], [1], [0, 0, 1, 1], [], []>} : vector<2x32xf32>, vector<32x32xf32>, vector<2x32xf32> -> vector<2x32xf32>
    %cst_52 = arith.constant dense<0.000000e+00> : vector<2x32xf32>
    %122 = tpu.matmul %116, %3, %cst_52 {dimension_numbers = #tpu.dot_dimension_numbers<[1], [0], [0], [1], [0, 0, 1, 1], [], []>} : vector<2x32xf32>, vector<32x32xf32>, vector<2x32xf32> -> vector<2x32xf32>
    %cst_53 = arith.constant dense<0.000000e+00> : vector<2x32xf32>
    %123 = tpu.matmul %116, %5, %cst_53 {dimension_numbers = #tpu.dot_dimension_numbers<[1], [0], [0], [1], [0, 0, 1, 1], [], []>} : vector<2x32xf32>, vector<32x32xf32>, vector<2x32xf32> -> vector<2x32xf32>
    %124 = arith.addf %123, %8 : vector<2x32xf32>
    %125 = arith.index_cast %c3_i32 : i32 to index
    %c0_54 = arith.constant 0 : index
    %c0_55 = arith.constant 0 : index
    %126 = vector.load %arg0[%125, %c0_54, %c0_55] : memref<8x2x32xf32, #tpu.memory_space<vmem>>, vector<1x2x32xf32>
    %127 = vector.shape_cast %126 : vector<1x2x32xf32> to vector<2x32xf32>
    %128 = arith.addf %127, %121 : vector<2x32xf32>
    %129 = arith.negf %128 : vector<2x32xf32>
    %130 = math.exp %129 : vector<2x32xf32>
    %cst_56 = arith.constant 1.000000e+00 : f32
    %131 = vector.broadcast %cst_56 : f32 to vector<2x32xf32>
    %132 = arith.addf %131, %130 : vector<2x32xf32>
    %133 = arith.divf %131, %132 : vector<2x32xf32>
    %134 = arith.index_cast %c3_i32 : i32 to index
    %c0_57 = arith.constant 0 : index
    %c0_58 = arith.constant 0 : index
    %135 = vector.load %arg1[%134, %c0_57, %c0_58] : memref<8x2x32xf32, #tpu.memory_space<vmem>>, vector<1x2x32xf32>
    %136 = vector.shape_cast %135 : vector<1x2x32xf32> to vector<2x32xf32>
    %137 = arith.addf %136, %122 : vector<2x32xf32>
    %138 = arith.negf %137 : vector<2x32xf32>
    %139 = math.exp %138 : vector<2x32xf32>
    %cst_59 = arith.constant 1.000000e+00 : f32
    %140 = vector.broadcast %cst_59 : f32 to vector<2x32xf32>
    %141 = arith.addf %140, %139 : vector<2x32xf32>
    %142 = arith.divf %140, %141 : vector<2x32xf32>
    %143 = arith.index_cast %c3_i32 : i32 to index
    %c0_60 = arith.constant 0 : index
    %c0_61 = arith.constant 0 : index
    %144 = vector.load %arg2[%143, %c0_60, %c0_61] : memref<8x2x32xf32, #tpu.memory_space<vmem>>, vector<1x2x32xf32>
    %145 = vector.shape_cast %144 : vector<1x2x32xf32> to vector<2x32xf32>
    %146 = arith.mulf %133, %124 : vector<2x32xf32>
    %147 = arith.addf %145, %146 : vector<2x32xf32>
    %148 = math.tanh %147 : vector<2x32xf32>
    %cst_62 = arith.constant 1.000000e+00 : f32
    %149 = vector.broadcast %cst_62 : f32 to vector<2x32xf32>
    %150 = arith.subf %149, %142 : vector<2x32xf32>
    %151 = arith.mulf %150, %148 : vector<2x32xf32>
    %152 = arith.mulf %142, %116 : vector<2x32xf32>
    %153 = arith.addf %151, %152 : vector<2x32xf32>
    %154 = arith.index_cast %c3_i32 : i32 to index
    %c0_63 = arith.constant 0 : index
    %c0_64 = arith.constant 0 : index
    %155 = vector.load %arg6[%154, %c0_63, %c0_64] : memref<8x2x32xf32, #tpu.memory_space<vmem>>, vector<1x2x32xf32>
    %156 = vector.shape_cast %155 : vector<1x2x32xf32> to vector<2x32xf32>
    %157 = vector.shape_cast %153 : vector<2x32xf32> to vector<1x2x32xf32>
    tpu.vector_store %arg6[%154, %c0_63, %c0_64], %157 {strides = array<i32>} : memref<8x2x32xf32, #tpu.memory_space<vmem>>, vector<1x2x32xf32>,
    %c4_i32 = arith.constant 4 : i32
    %cst_65 = arith.constant dense<0.000000e+00> : vector<2x32xf32>
    %158 = tpu.matmul %153, %1, %cst_65 {dimension_numbers = #tpu.dot_dimension_numbers<[1], [0], [0], [1], [0, 0, 1, 1], [], []>} : vector<2x32xf32>, vector<32x32xf32>, vector<2x32xf32> -> vector<2x32xf32>
    %cst_66 = arith.constant dense<0.000000e+00> : vector<2x32xf32>
    %159 = tpu.matmul %153, %3, %cst_66 {dimension_numbers = #tpu.dot_dimension_numbers<[1], [0], [0], [1], [0, 0, 1, 1], [], []>} : vector<2x32xf32>, vector<32x32xf32>, vector<2x32xf32> -> vector<2x32xf32>
    %cst_67 = arith.constant dense<0.000000e+00> : vector<2x32xf32>
    %160 = tpu.matmul %153, %5, %cst_67 {dimension_numbers = #tpu.dot_dimension_numbers<[1], [0], [0], [1], [0, 0, 1, 1], [], []>} : vector<2x32xf32>, vector<32x32xf32>, vector<2x32xf32> -> vector<2x32xf32>
    %161 = arith.addf %160, %8 : vector<2x32xf32>
    %162 = arith.index_cast %c4_i32 : i32 to index
    %c0_68 = arith.constant 0 : index
    %c0_69 = arith.constant 0 : index
    %163 = vector.load %arg0[%162, %c0_68, %c0_69] : memref<8x2x32xf32, #tpu.memory_space<vmem>>, vector<1x2x32xf32>
    %164 = vector.shape_cast %163 : vector<1x2x32xf32> to vector<2x32xf32>
    %165 = arith.addf %164, %158 : vector<2x32xf32>
    %166 = arith.negf %165 : vector<2x32xf32>
    %167 = math.exp %166 : vector<2x32xf32>
    %cst_70 = arith.constant 1.000000e+00 : f32
    %168 = vector.broadcast %cst_70 : f32 to vector<2x32xf32>
    %169 = arith.addf %168, %167 : vector<2x32xf32>
    %170 = arith.divf %168, %169 : vector<2x32xf32>
    %171 = arith.index_cast %c4_i32 : i32 to index
    %c0_71 = arith.constant 0 : index
    %c0_72 = arith.constant 0 : index
    %172 = vector.load %arg1[%171, %c0_71, %c0_72] : memref<8x2x32xf32, #tpu.memory_space<vmem>>, vector<1x2x32xf32>
    %173 = vector.shape_cast %172 : vector<1x2x32xf32> to vector<2x32xf32>
    %174 = arith.addf %173, %159 : vector<2x32xf32>
    %175 = arith.negf %174 : vector<2x32xf32>
    %176 = math.exp %175 : vector<2x32xf32>
    %cst_73 = arith.constant 1.000000e+00 : f32
    %177 = vector.broadcast %cst_73 : f32 to vector<2x32xf32>
    %178 = arith.addf %177, %176 : vector<2x32xf32>
    %179 = arith.divf %177, %178 : vector<2x32xf32>
    %180 = arith.index_cast %c4_i32 : i32 to index
    %c0_74 = arith.constant 0 : index
    %c0_75 = arith.constant 0 : index
    %181 = vector.load %arg2[%180, %c0_74, %c0_75] : memref<8x2x32xf32, #tpu.memory_space<vmem>>, vector<1x2x32xf32>
    %182 = vector.shape_cast %181 : vector<1x2x32xf32> to vector<2x32xf32>
    %183 = arith.mulf %170, %161 : vector<2x32xf32>
    %184 = arith.addf %182, %183 : vector<2x32xf32>
    %185 = math.tanh %184 : vector<2x32xf32>
    %cst_76 = arith.constant 1.000000e+00 : f32
    %186 = vector.broadcast %cst_76 : f32 to vector<2x32xf32>
    %187 = arith.subf %186, %179 : vector<2x32xf32>
    %188 = arith.mulf %187, %185 : vector<2x32xf32>
    %189 = arith.mulf %179, %153 : vector<2x32xf32>
    %190 = arith.addf %188, %189 : vector<2x32xf32>
    %191 = arith.index_cast %c4_i32 : i32 to index
    %c0_77 = arith.constant 0 : index
    %c0_78 = arith.constant 0 : index
    %192 = vector.load %arg6[%191, %c0_77, %c0_78] : memref<8x2x32xf32, #tpu.memory_space<vmem>>, vector<1x2x32xf32>
    %193 = vector.shape_cast %192 : vector<1x2x32xf32> to vector<2x32xf32>
    %194 = vector.shape_cast %190 : vector<2x32xf32> to vector<1x2x32xf32>
    tpu.vector_store %arg6[%191, %c0_77, %c0_78], %194 {strides = array<i32>} : memref<8x2x32xf32, #tpu.memory_space<vmem>>, vector<1x2x32xf32>,
    %c5_i32 = arith.constant 5 : i32
    %cst_79 = arith.constant dense<0.000000e+00> : vector<2x32xf32>
    %195 = tpu.matmul %190, %1, %cst_79 {dimension_numbers = #tpu.dot_dimension_numbers<[1], [0], [0], [1], [0, 0, 1, 1], [], []>} : vector<2x32xf32>, vector<32x32xf32>, vector<2x32xf32> -> vector<2x32xf32>
    %cst_80 = arith.constant dense<0.000000e+00> : vector<2x32xf32>
    %196 = tpu.matmul %190, %3, %cst_80 {dimension_numbers = #tpu.dot_dimension_numbers<[1], [0], [0], [1], [0, 0, 1, 1], [], []>} : vector<2x32xf32>, vector<32x32xf32>, vector<2x32xf32> -> vector<2x32xf32>
    %cst_81 = arith.constant dense<0.000000e+00> : vector<2x32xf32>
    %197 = tpu.matmul %190, %5, %cst_81 {dimension_numbers = #tpu.dot_dimension_numbers<[1], [0], [0], [1], [0, 0, 1, 1], [], []>} : vector<2x32xf32>, vector<32x32xf32>, vector<2x32xf32> -> vector<2x32xf32>
    %198 = arith.addf %197, %8 : vector<2x32xf32>
    %199 = arith.index_cast %c5_i32 : i32 to index
    %c0_82 = arith.constant 0 : index
    %c0_83 = arith.constant 0 : index
    %200 = vector.load %arg0[%199, %c0_82, %c0_83] : memref<8x2x32xf32, #tpu.memory_space<vmem>>, vector<1x2x32xf32>
    %201 = vector.shape_cast %200 : vector<1x2x32xf32> to vector<2x32xf32>
    %202 = arith.addf %201, %195 : vector<2x32xf32>
    %203 = arith.negf %202 : vector<2x32xf32>
    %204 = math.exp %203 : vector<2x32xf32>
    %cst_84 = arith.constant 1.000000e+00 : f32
    %205 = vector.broadcast %cst_84 : f32 to vector<2x32xf32>
    %206 = arith.addf %205, %204 : vector<2x32xf32>
    %207 = arith.divf %205, %206 : vector<2x32xf32>
    %208 = arith.index_cast %c5_i32 : i32 to index
    %c0_85 = arith.constant 0 : index
    %c0_86 = arith.constant 0 : index
    %209 = vector.load %arg1[%208, %c0_85, %c0_86] : memref<8x2x32xf32, #tpu.memory_space<vmem>>, vector<1x2x32xf32>
    %210 = vector.shape_cast %209 : vector<1x2x32xf32> to vector<2x32xf32>
    %211 = arith.addf %210, %196 : vector<2x32xf32>
    %212 = arith.negf %211 : vector<2x32xf32>
    %213 = math.exp %212 : vector<2x32xf32>
    %cst_87 = arith.constant 1.000000e+00 : f32
    %214 = vector.broadcast %cst_87 : f32 to vector<2x32xf32>
    %215 = arith.addf %214, %213 : vector<2x32xf32>
    %216 = arith.divf %214, %215 : vector<2x32xf32>
    %217 = arith.index_cast %c5_i32 : i32 to index
    %c0_88 = arith.constant 0 : index
    %c0_89 = arith.constant 0 : index
    %218 = vector.load %arg2[%217, %c0_88, %c0_89] : memref<8x2x32xf32, #tpu.memory_space<vmem>>, vector<1x2x32xf32>
    %219 = vector.shape_cast %218 : vector<1x2x32xf32> to vector<2x32xf32>
    %220 = arith.mulf %207, %198 : vector<2x32xf32>
    %221 = arith.addf %219, %220 : vector<2x32xf32>
    %222 = math.tanh %221 : vector<2x32xf32>
    %cst_90 = arith.constant 1.000000e+00 : f32
    %223 = vector.broadcast %cst_90 : f32 to vector<2x32xf32>
    %224 = arith.subf %223, %216 : vector<2x32xf32>
    %225 = arith.mulf %224, %222 : vector<2x32xf32>
    %226 = arith.mulf %216, %190 : vector<2x32xf32>
    %227 = arith.addf %225, %226 : vector<2x32xf32>
    %228 = arith.index_cast %c5_i32 : i32 to index
    %c0_91 = arith.constant 0 : index
    %c0_92 = arith.constant 0 : index
    %229 = vector.load %arg6[%228, %c0_91, %c0_92] : memref<8x2x32xf32, #tpu.memory_space<vmem>>, vector<1x2x32xf32>
    %230 = vector.shape_cast %229 : vector<1x2x32xf32> to vector<2x32xf32>
    %231 = vector.shape_cast %227 : vector<2x32xf32> to vector<1x2x32xf32>
    tpu.vector_store %arg6[%228, %c0_91, %c0_92], %231 {strides = array<i32>} : memref<8x2x32xf32, #tpu.memory_space<vmem>>, vector<1x2x32xf32>,
    %c6_i32 = arith.constant 6 : i32
    %cst_93 = arith.constant dense<0.000000e+00> : vector<2x32xf32>
    %232 = tpu.matmul %227, %1, %cst_93 {dimension_numbers = #tpu.dot_dimension_numbers<[1], [0], [0], [1], [0, 0, 1, 1], [], []>} : vector<2x32xf32>, vector<32x32xf32>, vector<2x32xf32> -> vector<2x32xf32>
    %cst_94 = arith.constant dense<0.000000e+00> : vector<2x32xf32>
    %233 = tpu.matmul %227, %3, %cst_94 {dimension_numbers = #tpu.dot_dimension_numbers<[1], [0], [0], [1], [0, 0, 1, 1], [], []>} : vector<2x32xf32>, vector<32x32xf32>, vector<2x32xf32> -> vector<2x32xf32>
    %cst_95 = arith.constant dense<0.000000e+00> : vector<2x32xf32>
    %234 = tpu.matmul %227, %5, %cst_95 {dimension_numbers = #tpu.dot_dimension_numbers<[1], [0], [0], [1], [0, 0, 1, 1], [], []>} : vector<2x32xf32>, vector<32x32xf32>, vector<2x32xf32> -> vector<2x32xf32>
    %235 = arith.addf %234, %8 : vector<2x32xf32>
    %236 = arith.index_cast %c6_i32 : i32 to index
    %c0_96 = arith.constant 0 : index
    %c0_97 = arith.constant 0 : index
    %237 = vector.load %arg0[%236, %c0_96, %c0_97] : memref<8x2x32xf32, #tpu.memory_space<vmem>>, vector<1x2x32xf32>
    %238 = vector.shape_cast %237 : vector<1x2x32xf32> to vector<2x32xf32>
    %239 = arith.addf %238, %232 : vector<2x32xf32>
    %240 = arith.negf %239 : vector<2x32xf32>
    %241 = math.exp %240 : vector<2x32xf32>
    %cst_98 = arith.constant 1.000000e+00 : f32
    %242 = vector.broadcast %cst_98 : f32 to vector<2x32xf32>
    %243 = arith.addf %242, %241 : vector<2x32xf32>
    %244 = arith.divf %242, %243 : vector<2x32xf32>
    %245 = arith.index_cast %c6_i32 : i32 to index
    %c0_99 = arith.constant 0 : index
    %c0_100 = arith.constant 0 : index
    %246 = vector.load %arg1[%245, %c0_99, %c0_100] : memref<8x2x32xf32, #tpu.memory_space<vmem>>, vector<1x2x32xf32>
    %247 = vector.shape_cast %246 : vector<1x2x32xf32> to vector<2x32xf32>
    %248 = arith.addf %247, %233 : vector<2x32xf32>
    %249 = arith.negf %248 : vector<2x32xf32>
    %250 = math.exp %249 : vector<2x32xf32>
    %cst_101 = arith.constant 1.000000e+00 : f32
    %251 = vector.broadcast %cst_101 : f32 to vector<2x32xf32>
    %252 = arith.addf %251, %250 : vector<2x32xf32>
    %253 = arith.divf %251, %252 : vector<2x32xf32>
    %254 = arith.index_cast %c6_i32 : i32 to index
    %c0_102 = arith.constant 0 : index
    %c0_103 = arith.constant 0 : index
    %255 = vector.load %arg2[%254, %c0_102, %c0_103] : memref<8x2x32xf32, #tpu.memory_space<vmem>>, vector<1x2x32xf32>
    %256 = vector.shape_cast %255 : vector<1x2x32xf32> to vector<2x32xf32>
    %257 = arith.mulf %244, %235 : vector<2x32xf32>
    %258 = arith.addf %256, %257 : vector<2x32xf32>
    %259 = math.tanh %258 : vector<2x32xf32>
    %cst_104 = arith.constant 1.000000e+00 : f32
    %260 = vector.broadcast %cst_104 : f32 to vector<2x32xf32>
    %261 = arith.subf %260, %253 : vector<2x32xf32>
    %262 = arith.mulf %261, %259 : vector<2x32xf32>
    %263 = arith.mulf %253, %227 : vector<2x32xf32>
    %264 = arith.addf %262, %263 : vector<2x32xf32>
    %265 = arith.index_cast %c6_i32 : i32 to index
    %c0_105 = arith.constant 0 : index
    %c0_106 = arith.constant 0 : index
    %266 = vector.load %arg6[%265, %c0_105, %c0_106] : memref<8x2x32xf32, #tpu.memory_space<vmem>>, vector<1x2x32xf32>
    %267 = vector.shape_cast %266 : vector<1x2x32xf32> to vector<2x32xf32>
    %268 = vector.shape_cast %264 : vector<2x32xf32> to vector<1x2x32xf32>
    tpu.vector_store %arg6[%265, %c0_105, %c0_106], %268 {strides = array<i32>} : memref<8x2x32xf32, #tpu.memory_space<vmem>>, vector<1x2x32xf32>,
    %c7_i32 = arith.constant 7 : i32
    %cst_107 = arith.constant dense<0.000000e+00> : vector<2x32xf32>
    %269 = tpu.matmul %264, %1, %cst_107 {dimension_numbers = #tpu.dot_dimension_numbers<[1], [0], [0], [1], [0, 0, 1, 1], [], []>} : vector<2x32xf32>, vector<32x32xf32>, vector<2x32xf32> -> vector<2x32xf32>
    %cst_108 = arith.constant dense<0.000000e+00> : vector<2x32xf32>
    %270 = tpu.matmul %264, %3, %cst_108 {dimension_numbers = #tpu.dot_dimension_numbers<[1], [0], [0], [1], [0, 0, 1, 1], [], []>} : vector<2x32xf32>, vector<32x32xf32>, vector<2x32xf32> -> vector<2x32xf32>
    %cst_109 = arith.constant dense<0.000000e+00> : vector<2x32xf32>
    %271 = tpu.matmul %264, %5, %cst_109 {dimension_numbers = #tpu.dot_dimension_numbers<[1], [0], [0], [1], [0, 0, 1, 1], [], []>} : vector<2x32xf32>, vector<32x32xf32>, vector<2x32xf32> -> vector<2x32xf32>
    %272 = arith.addf %271, %8 : vector<2x32xf32>
    %273 = arith.index_cast %c7_i32 : i32 to index
    %c0_110 = arith.constant 0 : index
    %c0_111 = arith.constant 0 : index
    %274 = vector.load %arg0[%273, %c0_110, %c0_111] : memref<8x2x32xf32, #tpu.memory_space<vmem>>, vector<1x2x32xf32>
    %275 = vector.shape_cast %274 : vector<1x2x32xf32> to vector<2x32xf32>
    %276 = arith.addf %275, %269 : vector<2x32xf32>
    %277 = arith.negf %276 : vector<2x32xf32>
    %278 = math.exp %277 : vector<2x32xf32>
    %cst_112 = arith.constant 1.000000e+00 : f32
    %279 = vector.broadcast %cst_112 : f32 to vector<2x32xf32>
    %280 = arith.addf %279, %278 : vector<2x32xf32>
    %281 = arith.divf %279, %280 : vector<2x32xf32>
    %282 = arith.index_cast %c7_i32 : i32 to index
    %c0_113 = arith.constant 0 : index
    %c0_114 = arith.constant 0 : index
    %283 = vector.load %arg1[%282, %c0_113, %c0_114] : memref<8x2x32xf32, #tpu.memory_space<vmem>>, vector<1x2x32xf32>
    %284 = vector.shape_cast %283 : vector<1x2x32xf32> to vector<2x32xf32>
    %285 = arith.addf %284, %270 : vector<2x32xf32>
    %286 = arith.negf %285 : vector<2x32xf32>
    %287 = math.exp %286 : vector<2x32xf32>
    %cst_115 = arith.constant 1.000000e+00 : f32
    %288 = vector.broadcast %cst_115 : f32 to vector<2x32xf32>
    %289 = arith.addf %288, %287 : vector<2x32xf32>
    %290 = arith.divf %288, %289 : vector<2x32xf32>
    %291 = arith.index_cast %c7_i32 : i32 to index
    %c0_116 = arith.constant 0 : index
    %c0_117 = arith.constant 0 : index
    %292 = vector.load %arg2[%291, %c0_116, %c0_117] : memref<8x2x32xf32, #tpu.memory_space<vmem>>, vector<1x2x32xf32>
    %293 = vector.shape_cast %292 : vector<1x2x32xf32> to vector<2x32xf32>
    %294 = arith.mulf %281, %272 : vector<2x32xf32>
    %295 = arith.addf %293, %294 : vector<2x32xf32>
    %296 = math.tanh %295 : vector<2x32xf32>
    %cst_118 = arith.constant 1.000000e+00 : f32
    %297 = vector.broadcast %cst_118 : f32 to vector<2x32xf32>
    %298 = arith.subf %297, %290 : vector<2x32xf32>
    %299 = arith.mulf %298, %296 : vector<2x32xf32>
    %300 = arith.mulf %290, %264 : vector<2x32xf32>
    %301 = arith.addf %299, %300 : vector<2x32xf32>
    %302 = arith.index_cast %c7_i32 : i32 to index
    %c0_119 = arith.constant 0 : index
    %c0_120 = arith.constant 0 : index
    %303 = vector.load %arg6[%302, %c0_119, %c0_120] : memref<8x2x32xf32, #tpu.memory_space<vmem>>, vector<1x2x32xf32>
    %304 = vector.shape_cast %303 : vector<1x2x32xf32> to vector<2x32xf32>
    %305 = vector.shape_cast %301 : vector<2x32xf32> to vector<1x2x32xf32>
    tpu.vector_store %arg6[%302, %c0_119, %c0_120], %305 {strides = array<i32>} : memref<8x2x32xf32, #tpu.memory_space<vmem>>, vector<1x2x32xf32>,
    %c8_i32 = arith.constant 8 : i32
    %c0_121 = arith.constant 0 : index
    %c0_122 = arith.constant 0 : index
    %306 = vector.load %arg7[%c0_121, %c0_122] : memref<2x32xf32, #tpu.memory_space<vmem>>, vector<2x32xf32>
    tpu.vector_store %arg7[%c0_121, %c0_122], %301 {strides = array<i32>} : memref<2x32xf32, #tpu.memory_space<vmem>>, vector<2x32xf32>,
    return
  }
}

module attributes {stable_mosaic.version = 11 : i64} {
  func.func @_input_proj_kernel(%arg0: memref<16x32xf32, #tpu.memory_space<vmem>>, %arg1: memref<3x32x32xf32, #tpu.memory_space<vmem>>, %arg2: memref<3x1x32xf32, #tpu.memory_space<vmem>>, %arg3: memref<3x1x32xf32, #tpu.memory_space<vmem>>, %arg4: memref<16x32xf32, #tpu.memory_space<vmem>>, %arg5: memref<16x32xf32, #tpu.memory_space<vmem>>, %arg6: memref<16x32xf32, #tpu.memory_space<vmem>>) attributes {dimension_semantics = [], scalar_prefetch = 0 : i64, scratch_operands = 0 : i64, tpu.core_type = #tpu.core_type<tc>} {
    %c0 = arith.constant 0 : index
    %c0_0 = arith.constant 0 : index
    %0 = vector.load %arg0[%c0, %c0_0] : memref<16x32xf32, #tpu.memory_space<vmem>>, vector<16x32xf32>
    %c0_1 = arith.constant 0 : index
    %c0_2 = arith.constant 0 : index
    %c0_3 = arith.constant 0 : index
    %1 = vector.load %arg1[%c0_1, %c0_2, %c0_3] : memref<3x32x32xf32, #tpu.memory_space<vmem>>, vector<1x32x32xf32>
    %2 = vector.shape_cast %1 : vector<1x32x32xf32> to vector<32x32xf32>
    %cst = arith.constant dense<0.000000e+00> : vector<16x32xf32>
    %3 = tpu.matmul %0, %2, %cst {dimension_numbers = #tpu.dot_dimension_numbers<[1], [0], [0], [1], [0, 0, 1, 1], [], []>} : vector<16x32xf32>, vector<32x32xf32>, vector<16x32xf32> -> vector<16x32xf32>
    %c0_4 = arith.constant 0 : index
    %c0_5 = arith.constant 0 : index
    %c0_6 = arith.constant 0 : index
    %4 = vector.load %arg2[%c0_4, %c0_5, %c0_6] : memref<3x1x32xf32, #tpu.memory_space<vmem>>, vector<1x1x32xf32>
    %5 = vector.shape_cast %4 : vector<1x1x32xf32> to vector<1x32xf32>
    %c0_7 = arith.constant 0 : index
    %c0_8 = arith.constant 0 : index
    %c0_9 = arith.constant 0 : index
    %6 = vector.load %arg3[%c0_7, %c0_8, %c0_9] : memref<3x1x32xf32, #tpu.memory_space<vmem>>, vector<1x1x32xf32>
    %7 = vector.shape_cast %6 : vector<1x1x32xf32> to vector<1x32xf32>
    %8 = arith.addf %5, %7 : vector<1x32xf32>
    %9 = vector.broadcast %8 : vector<1x32xf32> to vector<16x32xf32>
    %10 = arith.addf %3, %9 : vector<16x32xf32>
    %c0_10 = arith.constant 0 : index
    %c0_11 = arith.constant 0 : index
    %11 = vector.load %arg4[%c0_10, %c0_11] : memref<16x32xf32, #tpu.memory_space<vmem>>, vector<16x32xf32>
    tpu.vector_store %arg4[%c0_10, %c0_11], %10 {strides = array<i32>} : memref<16x32xf32, #tpu.memory_space<vmem>>, vector<16x32xf32>,
    %c1 = arith.constant 1 : index
    %c0_12 = arith.constant 0 : index
    %c0_13 = arith.constant 0 : index
    %12 = vector.load %arg1[%c1, %c0_12, %c0_13] : memref<3x32x32xf32, #tpu.memory_space<vmem>>, vector<1x32x32xf32>
    %13 = vector.shape_cast %12 : vector<1x32x32xf32> to vector<32x32xf32>
    %cst_14 = arith.constant dense<0.000000e+00> : vector<16x32xf32>
    %14 = tpu.matmul %0, %13, %cst_14 {dimension_numbers = #tpu.dot_dimension_numbers<[1], [0], [0], [1], [0, 0, 1, 1], [], []>} : vector<16x32xf32>, vector<32x32xf32>, vector<16x32xf32> -> vector<16x32xf32>
    %c1_15 = arith.constant 1 : index
    %c0_16 = arith.constant 0 : index
    %c0_17 = arith.constant 0 : index
    %15 = vector.load %arg2[%c1_15, %c0_16, %c0_17] : memref<3x1x32xf32, #tpu.memory_space<vmem>>, vector<1x1x32xf32>
    %16 = vector.shape_cast %15 : vector<1x1x32xf32> to vector<1x32xf32>
    %c1_18 = arith.constant 1 : index
    %c0_19 = arith.constant 0 : index
    %c0_20 = arith.constant 0 : index
    %17 = vector.load %arg3[%c1_18, %c0_19, %c0_20] : memref<3x1x32xf32, #tpu.memory_space<vmem>>, vector<1x1x32xf32>
    %18 = vector.shape_cast %17 : vector<1x1x32xf32> to vector<1x32xf32>
    %19 = arith.addf %16, %18 : vector<1x32xf32>
    %20 = vector.broadcast %19 : vector<1x32xf32> to vector<16x32xf32>
    %21 = arith.addf %14, %20 : vector<16x32xf32>
    %c0_21 = arith.constant 0 : index
    %c0_22 = arith.constant 0 : index
    %22 = vector.load %arg5[%c0_21, %c0_22] : memref<16x32xf32, #tpu.memory_space<vmem>>, vector<16x32xf32>
    tpu.vector_store %arg5[%c0_21, %c0_22], %21 {strides = array<i32>} : memref<16x32xf32, #tpu.memory_space<vmem>>, vector<16x32xf32>,
    %c2 = arith.constant 2 : index
    %c0_23 = arith.constant 0 : index
    %c0_24 = arith.constant 0 : index
    %23 = vector.load %arg1[%c2, %c0_23, %c0_24] : memref<3x32x32xf32, #tpu.memory_space<vmem>>, vector<1x32x32xf32>
    %24 = vector.shape_cast %23 : vector<1x32x32xf32> to vector<32x32xf32>
    %cst_25 = arith.constant dense<0.000000e+00> : vector<16x32xf32>
    %25 = tpu.matmul %0, %24, %cst_25 {dimension_numbers = #tpu.dot_dimension_numbers<[1], [0], [0], [1], [0, 0, 1, 1], [], []>} : vector<16x32xf32>, vector<32x32xf32>, vector<16x32xf32> -> vector<16x32xf32>
    %c2_26 = arith.constant 2 : index
    %c0_27 = arith.constant 0 : index
    %c0_28 = arith.constant 0 : index
    %26 = vector.load %arg2[%c2_26, %c0_27, %c0_28] : memref<3x1x32xf32, #tpu.memory_space<vmem>>, vector<1x1x32xf32>
    %27 = vector.shape_cast %26 : vector<1x1x32xf32> to vector<1x32xf32>
    %28 = vector.broadcast %27 : vector<1x32xf32> to vector<16x32xf32>
    %29 = arith.addf %25, %28 : vector<16x32xf32>
    %c0_29 = arith.constant 0 : index
    %c0_30 = arith.constant 0 : index
    %30 = vector.load %arg6[%c0_29, %c0_30] : memref<16x32xf32, #tpu.memory_space<vmem>>, vector<16x32xf32>
    tpu.vector_store %arg6[%c0_29, %c0_30], %29 {strides = array<i32>} : memref<16x32xf32, #tpu.memory_space<vmem>>, vector<16x32xf32>,
    return
  }
}

</mosaic_0001>

<bundles_post_ra>
// kernel: _decoder_pallas.5
= control target key start
LH: loop header
LB: loop body
LE: loop exit
PB: predicated region body
PF: predicated region fallthrough
CT: control target
= control target key end

     0   :  { %vm27_vm0 = vcmask 261120   ;;  %vm109_vm1 = vcmask 523264   ;;  %s185_s1 = inlined_call_operand.vmem [shape: f32[32,64], index: 1, kind: input, shape index: {}]   ;;  %s186_s0 = inlined_call_operand.vmem [shape: f32[16,32], index: 0, kind: input, shape index: {}]   ;;  %s187_s2 = inlined_call_operand.vmem [shape: f32[1,64], index: 2, kind: input, shape index: {}]   ;;  %s188_s3 = inlined_call_operand.vmem [shape: f32[16,64], index: 3, kind: output, shape index: {}]  }
   0x1   :  { %v19_v0 = vld [vmem:[%s185_s1 + $0x18] sm:$0xff]  ;;  %v18_v1 = vld [vmem:[%s185_s1 + $0x10] sm:$0xff]  ;;  %v14_v2 = vld [vmem:[%s186_s0] sm:$0xff] }
   0x2   :  { %125 = vmatprep.subr.mxu0 %v19_v0  ;;  %v17_v3 = vld [vmem:[%s185_s1 + $0x8] sm:$0xff]  ;;  %133 = vmatprep.mubr.msk.f32.mxu0 %vm27_vm0, %v14_v2  ;;  %v16_v4 = vld [vmem:[%s185_s1] sm:$0xff] }
   0x3   :  { %126 = vmatpush3.msra.mxu0 %v19_v0  ;;  %v15_v5 = vld [vmem:[%s186_s0 + $0x8] sm:$0xff]  ;;  %v116_v6 = vld [vmem:[%s187_s2] ss:$0 sm:$0xff] }
   0x4   :  { %127 = vmatprep.subr.mxu0 %v18_v1 }
   0x5   :  { %128 = vmatpush3.msra.mxu0 %v18_v1 }
   0x6   :  { %129 = vmatprep.subr.mxu0 %v17_v3 }
   0x7   :  { %130 = vmatpush3.msra.mxu0 %v17_v3 }
   0x8   :  { %131 = vmatprep.subr.mxu0 %v16_v4 }
   0x9   :  { %132 = vmatpush3.msra.mxu0 %v16_v4 }
   0xa   :  { %134 = vmatmul.mubr.msk.f32.vlgmr.msra.gmra.mxu0 %vm27_vm0, %v15_v5 }
  0xca   :  { %v135_v7 = vpop.f32.mrf.mxu0 }
  0xcb   :  { %v106_v8 = vadd.f32 %v135_v7, %v116_v6 }
  0xcc   :  { %v100_v9 = vpop.f32.mrf.mxu0 }
  0xcd   :  { %111 = vst.msk [vmem:[%s188_s3 + $0x8] sm:$0xff] %vm109_vm1, %v106_v8  ;;  %v101_v10 = vadd.f32 %v116_v6, %v100_v9 }
  0xcf   :  { %110 = vst.msk [vmem:[%s188_s3] sm:$0xff] %vm109_vm1, %v101_v10 }

// kernel: _decoder_pallas.3
= control target key start
LH: loop header
LB: loop body
LE: loop exit
PB: predicated region body
PF: predicated region fallthrough
CT: control target
= control target key end

     0   :  { %12 = vsyncpa [#allocation3], 0  ;;  %s543_s0 = inlined_call_operand.hbm [shape: f32[16,32], index: 0, kind: input, shape index: {}]   ;;  %s544_s1 = inlined_call_operand.hbm [shape: f32[3,32,32], index: 1, kind: input, shape index: {}]   ;;  %s545_s2 = inlined_call_operand.vmem [shape: f32[3,1,32], index: 2, kind: input, shape index: {}]   ;;  %s546_s3 = inlined_call_operand.vmem [shape: f32[3,1,32], index: 3, kind: input, shape index: {}]   ;;  %s547_s4 = inlined_call_operand.vmem [shape: f32[16,32], index: 4, kind: output, shape index: {0}]   ;;  %s548_s5 = inlined_call_operand.vmem [shape: f32[16,32], index: 5, kind: output, shape index: {1}]   ;;  %s549_s6 = inlined_call_operand.vmem [shape: f32[16,32], index: 6, kind: output, shape index: {2}]  }
   0x1   :  { %13 = vsyncpa [#allocation5], 0  ;;  %s453_s21 = smov [#allocation2]  }
   0x2   :  { %s19_s22 = sshll.u32 %s453_s21, 4  ;;  %s20_s22 = int_to_ptr.vmem [resolvable:$true] %s19_s22 }
   0x3   :  { %s417_s23 = scalar_lea.vmem %s20_s22, 256  ;;  %p422_p1 = scmp.lt.s32.totalorder %s20_s22, %s20_s22 }
   0x4   :  { %p418_p0 = scmp.ne.s32.totalorder %s20_s22, %s417_s23  ;;  %p423_p2 = scmp.lt.s32.totalorder %s417_s23, %s417_s23 }
   0x6   :  { %p424_p3 = por %p423_p2, %p422_p1 }
   0x8   :  { %p425_p4 = pnand %p424_p3, %p418_p0 }
   0xa   :  { %428 = shalt.err (!%p425_p4)
}
   0xb   :  { %s454_s24 = smov 128   ;;  %s455_s25 = smov 8  }
   0xc   :  { %25 = dma.hbm_to_vmem [thread:$0]  %s543_s0, 256, %s20_s22, [#allocation3], %s454_s24, %s454_s24, %s455_s25  }
   0xd   :  { %s456_s28 = smov [#allocation4]  }
   0xe   :  { %s31_s29 = sshll.u32 %s456_s28, 4  ;;  %s32_s29 = int_to_ptr.vmem [resolvable:$true] %s31_s29 }
   0xf   :  { %s437_s30 = scalar_lea.vmem %s32_s29, 1536  ;;  %p442_p6 = scmp.lt.s32.totalorder %s32_s29, %s32_s29 }
  0x10   :  { %p438_p5 = scmp.ne.s32.totalorder %s32_s29, %s437_s30  ;;  %p443_p7 = scmp.lt.s32.totalorder %s437_s30, %s437_s30 }
  0x12   :  { %p444_p8 = por %p443_p7, %p442_p6 }
  0x14   :  { %p445_p9 = pnand %p444_p8, %p438_p5 }
  0x16   :  { %448 = shalt.err (!%p445_p9)
}
  0x17   :  { %37 = dma.hbm_to_vmem [thread:$0]  %s544_s1, 1536, %s32_s29, [#allocation5], %s454_s24, %s454_s24, %s455_s25  }
  0x18   :  { %449 = dma.done.wait [#allocation3], 256  }
  0x19   :  { %450 = vsyncadd [#allocation3], 4294967040 }
  0x1a   :  { %451 = dma.done.wait [#allocation5], 1536  }
  0x1b   :  { %452 = vsyncadd [#allocation5], 4294965760  ;;  %v53_v0 = vld [vmem:[#allocation4 + $0x18] sm:$0xff]  ;;  %v52_v1 = vld [vmem:[#allocation4 + $0x10] sm:$0xff]  ;;  %vm63_vm0 = vcmask 261120   ;;  %v58_v14 = vlaneseq }
  0x1c   :  { %372 = vmatprep.subr.mxu0 %v53_v0  ;;  %v151_v2 = vld [vmem:[#allocation4 + $0x38] sm:$0xff]  ;;  %v48_v3 = vld [vmem:[#allocation2] sm:$0xff]  ;;  %v51_v4 = vld [vmem:[#allocation4 + $0x8] sm:$0xff] }
  0x1d   :  { %373 = vmatpush3.msra.mxu0 %v53_v0  ;;  %383 = vmatprep.subr.mxu1 %v151_v2  ;;  %v150_v5 = vld [vmem:[#allocation4 + $0x30] sm:$0xff]  ;;  %v50_v6 = vld [vmem:[#allocation4] sm:$0xff]  ;;  %v149_v7 = vld [vmem:[#allocation4 + $0x28] sm:$0xff]  ;;  %v59_v15 = vshrl.u32 %v58_v14, 7 }
  0x1e   :  { %374 = vmatprep.subr.mxu0 %v52_v1  ;;  %380 = vmatprep.mubr.msk.f32.mxu0 %vm63_vm0, %v48_v3  ;;  %v49_v8 = vld [vmem:[#allocation2 + $0x8] sm:$0xff]  ;;  %v148_v10 = vld [vmem:[#allocation4 + $0x20] sm:$0xff]  ;;  %v243_v11 = vld [vmem:[#allocation4 + $0x50] sm:$0xff] }
  0x1f   :  { %375 = vmatpush3.msra.mxu0 %v52_v1  ;;  %384 = vmatpush3.msra.mxu1 %v151_v2  ;;  %v244_v9 = vld [vmem:[#allocation4 + $0x58] sm:$0xff]  ;;  %v242_v12 = vld [vmem:[#allocation4 + $0x48] sm:$0xff]  ;;  %v241_v13 = vld [vmem:[#allocation4 + $0x40] sm:$0xff]  ;;  %v60_v19 = vsub.s32 0, %v59_v15 }
  0x20   :  { %376 = vmatprep.subr.mxu0 %v51_v4  ;;  %385 = vmatprep.subr.mxu1 %v150_v5  ;;  %v54_v16 = vld [vmem:[%s545_s2] sm:$0x1]  ;;  %v346_v20 = vld [vmem:[%s545_s2 + $0x1] sm:$0x1]  ;;  %v351_v32 = vld [vmem:[%s545_s2 + $0x2] ss:$0 sm:$0xff] }
  0x21   :  { %377 = vmatpush3.msra.mxu0 %v51_v4  ;;  %386 = vmatpush3.msra.mxu1 %v150_v5  ;;  %v55_v17 = vld [vmem:[%s546_s3] sm:$0x1]  ;;  %v347_v21 = vld [vmem:[%s546_s3 + $0x1] sm:$0x1] }
  0x22   :  { %378 = vmatprep.subr.mxu0 %v50_v6  ;;  %387 = vmatprep.subr.mxu1 %v149_v7  ;;  %v56_v18 = vadd.f32 %v55_v17, %v54_v16  ;;  %v156_v23 = vadd.f32 %v347_v21, %v346_v20 }
  0x23   :  { %379 = vmatpush3.msra.mxu0 %v50_v6  ;;  %388 = vmatpush3.msra.mxu1 %v149_v7 }
  0x24   :  { %381 = vmatmul.mubr.msk.f32.vlgmr.msra.gmra.mxu0 %vm63_vm0, %v49_v8  ;;  %394 = vmatprep.subr.mxu0 %v244_v9  ;;  %v61_v22 = vrot.slane %v56_v18, %v60_v19  ;;  %v161_v26 = vrot.slane %v156_v23, %v60_v19 }
  0x25   :  { %395 = vmatpush3.msra.mxu0 %v244_v9  ;;  %389 = vmatprep.subr.mxu1 %v148_v10 }
  0x26   :  { %396 = vmatprep.subr.mxu0 %v243_v11  ;;  %390 = vmatpush3.msra.mxu1 %v148_v10 }
  0x27   :  { %397 = vmatpush3.msra.mxu0 %v243_v11  ;;  %391 = vmatprep.mubr.msk.f32.mxu1 %vm63_vm0, %v48_v3 }
  0x28   :  { %398 = vmatprep.subr.mxu0 %v242_v12  ;;  %392 = vmatmul.mubr.msk.f32.vlgmr.msra.gmra.mxu1 %vm63_vm0, %v49_v8 }
  0x29   :  { %399 = vmatpush3.msra.mxu0 %v242_v12  ;;  %402 = vmatprep.mubr.msk.f32.mxu0 %vm63_vm0, %v48_v3 }
  0x2a   :  { %400 = vmatprep.subr.mxu0 %v241_v13 }
  0x2b   :  { %401 = vmatpush3.msra.mxu0 %v241_v13 }
  0x2c   :  { %403 = vmatmul.mubr.msk.f32.vlgmr.msra.gmra.mxu0 %vm63_vm0, %v49_v8 }
  0xe4   :  { %v382_v24 = vpop.f32.mrf.mxu0 }
  0xe5   :  { %v142_v25 = vadd.f32 %v382_v24, %v61_v22 }
  0xe6   :  { %v136_v27 = vpop.f32.mrf.mxu0 }
  0xe7   :  { %146 = vst.msk [vmem:[%s547_s4 + $0x8] sm:$0xff] %vm63_vm0, %v142_v25  ;;  %v137_v28 = vadd.f32 %v136_v27, %v61_v22 }
  0xe8   :  { %v393_v29 = vpop.f32.mrf.mxu1 }
  0xe9   :  { %145 = vst.msk [vmem:[%s547_s4] sm:$0xff] %vm63_vm0, %v137_v28  ;;  %v235_v30 = vadd.f32 %v393_v29, %v161_v26 }
  0xea   :  { %v229_v31 = vpop.f32.mrf.mxu1 }
  0xeb   :  { %239 = vst.msk [vmem:[%s548_s5 + $0x8] sm:$0xff] %vm63_vm0, %v235_v30  ;;  %v230_v33 = vadd.f32 %v229_v31, %v161_v26 }
  0xec   :  { %v404_v34 = vpop.f32.mrf.mxu0 }
  0xed   :  { %238 = vst.msk [vmem:[%s548_s5] sm:$0xff] %vm63_vm0, %v230_v33  ;;  %v325_v35 = vadd.f32 %v404_v34, %v351_v32 }
  0xee   :  { %v319_v36 = vpop.f32.mrf.mxu0 }
  0xef   :  { %329 = vst.msk [vmem:[%s549_s6 + $0x8] sm:$0xff] %vm63_vm0, %v325_v35  ;;  %v320_v37 = vadd.f32 %v351_v32, %v319_v36 }
  0xf1   :  { %328 = vst.msk [vmem:[%s549_s6] sm:$0xff] %vm63_vm0, %v320_v37 }
  0xf2   :  { %342 = vsyncpa [#allocation3], 1 }
  0xf3   :  { %343 = vsyncpa [#allocation5], 1 }

// kernel: _decoder_pallas.4
= control target key start
LH: loop header
LB: loop body
LE: loop exit
PB: predicated region body
PF: predicated region fallthrough
CT: control target
= control target key end

     0   :  { %v2567_v1 = vmov 0.0   ;;  %vm2568_vm0 = vmmov 0   ;;  %s3064_s0 = inlined_call_operand.vmem [shape: f32[8,2,32], index: 0, kind: input, shape index: {}]   ;;  %s3065_s1 = inlined_call_operand.vmem [shape: f32[8,2,32], index: 1, kind: input, shape index: {}]   ;;  %s3066_s2 = inlined_call_operand.vmem [shape: f32[8,2,32], index: 2, kind: input, shape index: {}]   ;;  %s3067_s3 = inlined_call_operand.vmem [shape: f32[2,32], index: 3, kind: input, shape index: {}]   ;;  %s3068_s4 = inlined_call_operand.vmem [shape: f32[3,32,32], index: 4, kind: input, shape index: {}]   ;;  %s3069_s5 = inlined_call_operand.vmem [shape: f32[1,32], index: 5, kind: input, shape index: {}]   ;;  %s3070_s6 = inlined_call_operand.vmem [shape: f32[8,2,32], index: 6, kind: output, shape index: {0}]   ;;  %s3071_s7 = inlined_call_operand.hbm [shape: f32[2,32], index: 7, kind: output, shape index: {1}]  }
   0x1   :  { %v2613_v0 = vld [vmem:[%s3068_s4 + $0x18] sm:$0xff]  ;;  %2198 = vmatprep.subr.mxu0 %v2567_v1  ;;  %v2619_v2 = vld [vmem:[%s3068_s4 + $0x10] sm:$0xff]  ;;  %2206 = vmatprep.mubr.msk.f32.mxu0 %vm2568_vm0, %v2567_v1  ;;  %v2639_v5 = vld [vmem:[%s3068_s4 + $0x8] sm:$0xff] }
   0x2   :  { %v2626_v3 = vld [vmem:[%s3068_s4 + $0x38] sm:$0xff]  ;;  %2199 = vmatpush3.msra.mxu0 %v2613_v0  ;;  %2209 = vmatprep.subr.mxu1 %v2567_v1  ;;  %v2633_v4 = vld [vmem:[%s3068_s4 + $0x30] sm:$0xff]  ;;  %v2647_v6 = vld [vmem:[%s3068_s4 + $0x28] sm:$0xff] }
   0x3   :  { %2200 = vmatprep.subr.mxu0 %v2567_v1  ;;  %2210 = vmatpush3.msra.mxu1 %v2626_v3 }
   0x4   :  { %2201 = vmatpush3.msra.mxu0 %v2619_v2  ;;  %2211 = vmatprep.subr.mxu1 %v2567_v1 }
   0x5   :  { %13 = vsyncpa [#allocation3], 0  ;;  %2202 = vmatprep.subr.mxu0 %v2567_v1  ;;  %v2653_v7 = vld [vmem:[%s3068_s4] sm:$0xff]  ;;  %2212 = vmatpush3.msra.mxu1 %v2633_v4  ;;  %vm48_vm1 = vcmask 261120   ;;  %v2675_v10 = vld [vmem:[%s3068_s4 + $0x58] sm:$0xff]  ;;  %vm286_vm2 = vcmask 254976  }
   0x6   :  { %2203 = vmatpush3.msra.mxu0 %v2639_v5  ;;  %v2660_v8 = vld [vmem:[%s3067_s3] sm:$0x3]  ;;  %2213 = vmatprep.subr.mxu1 %v2567_v1  ;;  %v2686_v11 = vld [vmem:[%s3068_s4 + $0x50] sm:$0xff]  ;;  %v2695_v12 = vld [vmem:[%s3068_s4 + $0x48] sm:$0xff] }
   0x7   :  { %v2666_v9 = vld [vmem:[%s3068_s4 + $0x20] sm:$0xff]  ;;  %2204 = vmatprep.subr.mxu0 %v2567_v1  ;;  %2214 = vmatpush3.msra.mxu1 %v2647_v6 }
   0x8   :  { %2205 = vmatpush3.msra.mxu0 %v2653_v7  ;;  %2215 = vmatprep.subr.mxu1 %v2567_v1  ;;  %v2705_v13 = vld [vmem:[%s3068_s4 + $0x40] sm:$0xff] }
   0x9   :  { %2207 = vmatmul.mubr.msk.f32.vlgmr.msra.gmra.mxu0 %vm48_vm1, %v2660_v8  ;;  %2216 = vmatpush3.msra.mxu1 %v2666_v9  ;;  %v262_v14 = vld [vmem:[%s3064_s0] sm:$0x3]  ;;  %v2018_v42 = vld [vmem:[%s3064_s0 + $0x2] sm:$0x3] }
   0xa   :  { %2217 = vmatprep.mubr.msk.f32.mxu1 %vm2568_vm0, %v2567_v1  ;;  %2220 = vmatprep.subr.mxu0 %v2567_v1  ;;  %v270_v19 = vld [vmem:[%s3065_s1] sm:$0x3]  ;;  %v2020_v49 = vld [vmem:[%s3065_s1 + $0x2] sm:$0x3] }
   0xb   :  { %2218 = vmatmul.mubr.msk.f32.vlgmr.msra.gmra.mxu1 %vm48_vm1, %v2660_v8  ;;  %2221 = vmatpush3.msra.mxu0 %v2675_v10  ;;  %v2742_v29 = vld [vmem:[%s3069_s5] ss:$0 sm:$0xff]  ;;  %v2022_v60 = vld [vmem:[%s3066_s2 + $0x2] sm:$0x3] }
   0xc   :  { %2222 = vmatprep.subr.mxu0 %v2567_v1  ;;  %2228 = vmatprep.mubr.msk.f32.mxu0 %vm2568_vm0, %v2567_v1  ;;  %v278_v33 = vld [vmem:[%s3066_s2] sm:$0x3] }
   0xd   :  { %2223 = vmatpush3.msra.mxu0 %v2686_v11  ;;  %2231 = vmatprep.subr.mxu1 %v2567_v1 }
   0xe   :  { %2224 = vmatprep.subr.mxu0 %v2567_v1  ;;  %2232 = vmatpush3.msra.mxu1 %v2613_v0 }
   0xf   :  { %2225 = vmatpush3.msra.mxu0 %v2695_v12  ;;  %2233 = vmatprep.subr.mxu1 %v2567_v1 }
  0x10   :  { %2226 = vmatprep.subr.mxu0 %v2567_v1  ;;  %2234 = vmatpush3.msra.mxu1 %v2619_v2 }
  0x11   :  { %2227 = vmatpush3.msra.mxu0 %v2705_v13  ;;  %2235 = vmatprep.subr.mxu1 %v2567_v1 }
  0x12   :  { %2229 = vmatmul.mubr.msk.f32.vlgmr.msra.gmra.mxu0 %vm48_vm1, %v2660_v8  ;;  %2242 = vmatprep.subr.mxu0 %v2567_v1 }
  0x13   :  { %2243 = vmatpush3.msra.mxu0 %v2626_v3  ;;  %2236 = vmatpush3.msra.mxu1 %v2639_v5 }
  0x14   :  { %2244 = vmatprep.subr.mxu0 %v2567_v1  ;;  %2237 = vmatprep.subr.mxu1 %v2567_v1 }
  0x15   :  { %2245 = vmatpush3.msra.mxu0 %v2633_v4  ;;  %2238 = vmatpush3.msra.mxu1 %v2653_v7 }
  0x16   :  { %2246 = vmatprep.subr.mxu0 %v2567_v1  ;;  %2239 = vmatprep.mubr.msk.f32.mxu1 %vm2568_vm0, %v2567_v1 }
  0x17   :  { %2247 = vmatpush3.msra.mxu0 %v2647_v6  ;;  %2250 = vmatprep.mubr.msk.f32.mxu0 %vm2568_vm0, %v2567_v1 }
  0x18   :  { %2248 = vmatprep.subr.mxu0 %v2567_v1  ;;  %2253 = vmatprep.subr.mxu1 %v2567_v1 }
  0x19   :  { %2249 = vmatpush3.msra.mxu0 %v2666_v9 }
  0x1a   :  { %2264 = vmatprep.subr.mxu0 %v2567_v1 }
  0xc9   :  { %v118_v15 = vpop.f32.mrf.mxu0 }
  0xca   :  { %v263_v16 = vadd.f32 %v262_v14, %v118_v15 }
  0xcb   :  { %v2208_v17 = vpop.f32.mrf.mxu0  ;;  %v188_v18 = vpop.f32.mrf.mxu1 }
  0xcc   :  { %v2013_v20 = vmul.f32 -1.442695, %v263_v16  ;;  %v271_v22 = vadd.f32 %v270_v19, %v188_v18  ;;  %v2027_v18 = vld [vmem:[%s3064_s0 + $0x4] sm:$0x3] }
  0xcd   :  { %v2219_v21 = vpop.f32.mrf.mxu1 }
  0xce   :  { %2465 = vpow2.f32 %v2013_v20  ;;  %v2014_v23 = vmul.f32 -1.442695, %v271_v22 }
  0xd0   :  { %2467 = vpow2.f32 %v2014_v23 }
  0xd2   :  { %v258_v24 = vpop.f32.mrf.mxu0 }
  0xd3   :  { %v259_v31 = vadd.f32 %v2742_v29, %v258_v24 }
  0xd4   :  { %v2230_v25 = vpop.f32.mrf.mxu0 }
  0xd5   :  { %v2029_v25 = vld [vmem:[%s3065_s1 + $0x4] sm:$0x3] }
  0xdb   :  { %v2466_v26 = vpop.eup %2465 }
  0xdc   :  { %v267_v27 = vadd.f32 1.0, %v2466_v26 }
  0xdd   :  { %v2468_v28 = vpop.eup %2467 }
  0xde   :  { %2469 = vrcp.f32 %v267_v27  ;;  %v275_v30 = vadd.f32 1.0, %v2468_v28 }
  0xe0   :  { %2471 = vrcp.f32 %v275_v30 }
  0xeb   :  { %v2470_v32 = vpop.eup %2469 }
  0xec   :  { %v279_v34 = vmul.f32 %v2470_v32, %v259_v31 }
  0xed   :  { %v2472_v36 = vpop.eup %2471 }
  0xee   :  { %v280_v35 = vadd.f32 %v279_v34, %v278_v33  ;;  %v282_v37 = vsub.f32 1.0, %v2472_v36  ;;  %v284_v40 = vmul.f32 %v2472_v36, %v2660_v8 }
  0xf0   :  { %2473 = vtanh.f32 %v280_v35 }
  0xfd   :  { %v2474_v38 = vpop.eup %2473 }
  0xfe   :  { %v283_v39 = vmul.f32 %v2474_v38, %v282_v37  ;;  %v2031_v37 = vld [vmem:[%s3066_s2 + $0x4] sm:$0x3] }
 0x100   :  { %v285_v41 = vadd.f32 %v284_v40, %v283_v39 }
 0x102   :  { %2240 = vmatmul.mubr.msk.f32.vlgmr.msra.gmra.mxu1 %vm48_vm1, %v285_v41  ;;  %2251 = vmatmul.mubr.msk.f32.vlgmr.msra.gmra.mxu0 %vm48_vm1, %v285_v41  ;;  %287 = vst.msk [vmem:[%s3070_s6] sm:$0x3] %vm286_vm2, %v285_v41 }
 0x103   :  { %2254 = vmatpush3.msra.mxu1 %v2675_v10  ;;  %2261 = vmatprep.mubr.msk.f32.mxu1 %vm2568_vm0, %v2567_v1 }
 0x104   :  { %2255 = vmatprep.subr.mxu1 %v2567_v1  ;;  %2265 = vmatpush3.msra.mxu0 %v2613_v0 }
 0x105   :  { %2256 = vmatpush3.msra.mxu1 %v2686_v11  ;;  %2266 = vmatprep.subr.mxu0 %v2567_v1 }
 0x106   :  { %2257 = vmatprep.subr.mxu1 %v2567_v1  ;;  %2267 = vmatpush3.msra.mxu0 %v2619_v2 }
 0x107   :  { %2258 = vmatpush3.msra.mxu1 %v2695_v12  ;;  %2268 = vmatprep.subr.mxu0 %v2567_v1 }
 0x108   :  { %2259 = vmatprep.subr.mxu1 %v2567_v1  ;;  %2269 = vmatpush3.msra.mxu0 %v2639_v5 }
 0x109   :  { %2260 = vmatpush3.msra.mxu1 %v2705_v13  ;;  %2270 = vmatprep.subr.mxu0 %v2567_v1 }
 0x10a   :  { %2262 = vmatmul.mubr.msk.f32.vlgmr.msra.gmra.mxu1 %vm48_vm1, %v285_v41  ;;  %2275 = vmatprep.subr.mxu1 %v2567_v1 }
 0x10b   :  { %2276 = vmatpush3.msra.mxu1 %v2626_v3  ;;  %2271 = vmatpush3.msra.mxu0 %v2653_v7 }
 0x10c   :  { %2277 = vmatprep.subr.mxu1 %v2567_v1  ;;  %2272 = vmatprep.mubr.msk.f32.mxu0 %vm2568_vm0, %v2567_v1 }
 0x10d   :  { %2278 = vmatpush3.msra.mxu1 %v2633_v4  ;;  %2283 = vmatprep.mubr.msk.f32.mxu1 %vm2568_vm0, %v2567_v1 }
 0x10e   :  { %2279 = vmatprep.subr.mxu1 %v2567_v1  ;;  %2286 = vmatprep.subr.mxu0 %v2567_v1 }
 0x10f   :  { %2280 = vmatpush3.msra.mxu1 %v2647_v6 }
 0x110   :  { %2281 = vmatprep.subr.mxu1 %v2567_v1 }
 0x111   :  { %2282 = vmatpush3.msra.mxu1 %v2666_v9 }
 0x112   :  { %2297 = vmatprep.subr.mxu1 %v2567_v1 }
 0x1c2   :  { %v357_v43 = vpop.f32.mrf.mxu1  ;;  %v427_v44 = vpop.f32.mrf.mxu0 }
 0x1c3   :  { %v503_v45 = vadd.f32 %v2018_v42, %v357_v43  ;;  %v512_v50 = vadd.f32 %v2020_v49, %v427_v44 }
 0x1c4   :  { %v2241_v46 = vpop.f32.mrf.mxu1  ;;  %v2252_v47 = vpop.f32.mrf.mxu0 }
 0x1c5   :  { %v2019_v48 = vmul.f32 -1.442695, %v503_v45  ;;  %v2021_v53 = vmul.f32 -1.442695, %v512_v50  ;;  %v2036_v46 = vld [vmem:[%s3064_s0 + $0x6] sm:$0x3] }
 0x1c7   :  { %2475 = vpow2.f32 %v2019_v48 }
 0x1c8   :  { %2477 = vpow2.f32 %v2021_v53  ;;  %v2038_v53 = vld [vmem:[%s3065_s1 + $0x6] sm:$0x3] }
 0x1ca   :  { %v497_v51 = vpop.f32.mrf.mxu1 }
 0x1cb   :  { %v498_v58 = vadd.f32 %v2742_v29, %v497_v51 }
 0x1cc   :  { %v2263_v52 = vpop.f32.mrf.mxu1 }
 0x1d4   :  { %v2476_v54 = vpop.eup %2475 }
 0x1d5   :  { %v507_v55 = vadd.f32 1.0, %v2476_v54  ;;  %v2478_v56 = vpop.eup %2477 }
 0x1d6   :  { %v516_v57 = vadd.f32 1.0, %v2478_v56 }
 0x1d7   :  { %2479 = vrcp.f32 %v507_v55 }
 0x1d8   :  { %2481 = vrcp.f32 %v516_v57 }
 0x1e4   :  { %v2480_v59 = vpop.eup %2479 }
 0x1e5   :  { %v521_v61 = vmul.f32 %v2480_v59, %v498_v58  ;;  %v2482_v63 = vpop.eup %2481 }
 0x1e6   :  { %v524_v8 = vsub.f32 1.0, %v2482_v63  ;;  %v526_v16 = vmul.f32 %v2482_v63, %v285_v41 }
 0x1e7   :  { %v522_v62 = vadd.f32 %v2022_v60, %v521_v61 }
 0x1e9   :  { %2483 = vtanh.f32 %v522_v62 }
 0x1f6   :  { %v2484_v14 = vpop.eup %2483 }
 0x1f7   :  { %v525_v15 = vmul.f32 %v2484_v14, %v524_v8  ;;  %v2040_v8 = vld [vmem:[%s3066_s2 + $0x6] sm:$0x3] }
 0x1f9   :  { %v527_v17 = vadd.f32 %v526_v16, %v525_v15 }
 0x1fb   :  { %2273 = vmatmul.mubr.msk.f32.vlgmr.msra.gmra.mxu0 %vm48_vm1, %v527_v17  ;;  %2284 = vmatmul.mubr.msk.f32.vlgmr.msra.gmra.mxu1 %vm48_vm1, %v527_v17  ;;  %2023 = vst.msk [vmem:[%s3070_s6 + $0x2] sm:$0x3] %vm286_vm2, %v527_v17 }
 0x1fc   :  { %2287 = vmatpush3.msra.mxu0 %v2675_v10  ;;  %2294 = vmatprep.mubr.msk.f32.mxu0 %vm2568_vm0, %v2567_v1 }
 0x1fd   :  { %2288 = vmatprep.subr.mxu0 %v2567_v1  ;;  %2298 = vmatpush3.msra.mxu1 %v2613_v0 }
 0x1fe   :  { %2289 = vmatpush3.msra.mxu0 %v2686_v11  ;;  %2299 = vmatprep.subr.mxu1 %v2567_v1 }
 0x1ff   :  { %2290 = vmatprep.subr.mxu0 %v2567_v1  ;;  %2300 = vmatpush3.msra.mxu1 %v2619_v2 }
 0x200   :  { %2291 = vmatpush3.msra.mxu0 %v2695_v12  ;;  %2301 = vmatprep.subr.mxu1 %v2567_v1 }
 0x201   :  { %2292 = vmatprep.subr.mxu0 %v2567_v1  ;;  %2302 = vmatpush3.msra.mxu1 %v2639_v5 }
 0x202   :  { %2293 = vmatpush3.msra.mxu0 %v2705_v13  ;;  %2303 = vmatprep.subr.mxu1 %v2567_v1 }
 0x203   :  { %2295 = vmatmul.mubr.msk.f32.vlgmr.msra.gmra.mxu0 %vm48_vm1, %v527_v17  ;;  %2308 = vmatprep.subr.mxu0 %v2567_v1 }
 0x204   :  { %2309 = vmatpush3.msra.mxu0 %v2626_v3  ;;  %2304 = vmatpush3.msra.mxu1 %v2653_v7 }
 0x205   :  { %2310 = vmatprep.subr.mxu0 %v2567_v1  ;;  %2305 = vmatprep.mubr.msk.f32.mxu1 %vm2568_vm0, %v2567_v1 }
 0x206   :  { %2311 = vmatpush3.msra.mxu0 %v2633_v4  ;;  %2316 = vmatprep.mubr.msk.f32.mxu0 %vm2568_vm0, %v2567_v1 }
 0x207   :  { %2312 = vmatprep.subr.mxu0 %v2567_v1  ;;  %2319 = vmatprep.subr.mxu1 %v2567_v1 }
 0x208   :  { %2313 = vmatpush3.msra.mxu0 %v2647_v6 }
 0x209   :  { %2314 = vmatprep.subr.mxu0 %v2567_v1 }
 0x20a   :  { %2315 = vmatpush3.msra.mxu0 %v2666_v9 }
 0x20b   :  { %2330 = vmatprep.subr.mxu0 %v2567_v1 }
 0x2bb   :  { %v599_v19 = vpop.f32.mrf.mxu0  ;;  %v669_v20 = vpop.f32.mrf.mxu1 }
 0x2bc   :  { %v745_v21 = vadd.f32 %v2027_v18, %v599_v19  ;;  %v754_v26 = vadd.f32 %v2029_v25, %v669_v20 }
 0x2bd   :  { %v2274_v22 = vpop.f32.mrf.mxu0  ;;  %v2285_v23 = vpop.f32.mrf.mxu1 }
 0x2be   :  { %v2028_v24 = vmul.f32 -1.442695, %v745_v21  ;;  %v2030_v30 = vmul.f32 -1.442695, %v754_v26  ;;  %v2045_v22 = vld [vmem:[%s3064_s0 + $0x8] sm:$0x3] }
 0x2c0   :  { %2485 = vpow2.f32 %v2028_v24 }
 0x2c1   :  { %2487 = vpow2.f32 %v2030_v30  ;;  %v2047_v30 = vld [vmem:[%s3065_s1 + $0x8] sm:$0x3] }
 0x2c3   :  { %v739_v27 = vpop.f32.mrf.mxu0 }
 0x2c4   :  { %v740_v35 = vadd.f32 %v2742_v29, %v739_v27 }
 0x2c5   :  { %v2296_v28 = vpop.f32.mrf.mxu0 }
 0x2cd   :  { %v2486_v31 = vpop.eup %2485 }
 0x2ce   :  { %v749_v32 = vadd.f32 1.0, %v2486_v31  ;;  %v2488_v33 = vpop.eup %2487 }
 0x2cf   :  { %v758_v34 = vadd.f32 1.0, %v2488_v33 }
 0x2d0   :  { %2489 = vrcp.f32 %v749_v32 }
 0x2d1   :  { %2491 = vrcp.f32 %v758_v34 }
 0x2dd   :  { %v2490_v36 = vpop.eup %2489 }
 0x2de   :  { %v763_v38 = vmul.f32 %v2490_v36, %v740_v35  ;;  %v2492_v40 = vpop.eup %2491 }
 0x2df   :  { %v766_v41 = vsub.f32 1.0, %v2492_v40  ;;  %v768_v44 = vmul.f32 %v2492_v40, %v527_v17 }
 0x2e0   :  { %v764_v39 = vadd.f32 %v2031_v37, %v763_v38 }
 0x2e2   :  { %2493 = vtanh.f32 %v764_v39 }
 0x2ef   :  { %v2494_v42 = vpop.eup %2493 }
 0x2f0   :  { %v767_v43 = vmul.f32 %v2494_v42, %v766_v41  ;;  %v2049_v41 = vld [vmem:[%s3066_s2 + $0x8] sm:$0x3] }
 0x2f2   :  { %v769_v45 = vadd.f32 %v768_v44, %v767_v43 }
 0x2f4   :  { %2306 = vmatmul.mubr.msk.f32.vlgmr.msra.gmra.mxu1 %vm48_vm1, %v769_v45  ;;  %2317 = vmatmul.mubr.msk.f32.vlgmr.msra.gmra.mxu0 %vm48_vm1, %v769_v45  ;;  %2032 = vst.msk [vmem:[%s3070_s6 + $0x4] sm:$0x3] %vm286_vm2, %v769_v45 }
 0x2f5   :  { %2320 = vmatpush3.msra.mxu1 %v2675_v10  ;;  %2327 = vmatprep.mubr.msk.f32.mxu1 %vm2568_vm0, %v2567_v1 }
 0x2f6   :  { %2321 = vmatprep.subr.mxu1 %v2567_v1  ;;  %2331 = vmatpush3.msra.mxu0 %v2613_v0 }
 0x2f7   :  { %2322 = vmatpush3.msra.mxu1 %v2686_v11  ;;  %2332 = vmatprep.subr.mxu0 %v2567_v1 }
 0x2f8   :  { %2323 = vmatprep.subr.mxu1 %v2567_v1  ;;  %2333 = vmatpush3.msra.mxu0 %v2619_v2 }
 0x2f9   :  { %2324 = vmatpush3.msra.mxu1 %v2695_v12  ;;  %2334 = vmatprep.subr.mxu0 %v2567_v1 }
 0x2fa   :  { %2325 = vmatprep.subr.mxu1 %v2567_v1  ;;  %2335 = vmatpush3.msra.mxu0 %v2639_v5 }
 0x2fb   :  { %2326 = vmatpush3.msra.mxu1 %v2705_v13  ;;  %2336 = vmatprep.subr.mxu0 %v2567_v1 }
 0x2fc   :  { %2328 = vmatmul.mubr.msk.f32.vlgmr.msra.gmra.mxu1 %vm48_vm1, %v769_v45  ;;  %2341 = vmatprep.subr.mxu1 %v2567_v1 }
 0x2fd   :  { %2342 = vmatpush3.msra.mxu1 %v2626_v3  ;;  %2337 = vmatpush3.msra.mxu0 %v2653_v7 }
 0x2fe   :  { %2343 = vmatprep.subr.mxu1 %v2567_v1  ;;  %2338 = vmatprep.mubr.msk.f32.mxu0 %vm2568_vm0, %v2567_v1 }
 0x2ff   :  { %2344 = vmatpush3.msra.mxu1 %v2633_v4  ;;  %2349 = vmatprep.mubr.msk.f32.mxu1 %vm2568_vm0, %v2567_v1 }
 0x300   :  { %2345 = vmatprep.subr.mxu1 %v2567_v1  ;;  %2352 = vmatprep.subr.mxu0 %v2567_v1 }
 0x301   :  { %2346 = vmatpush3.msra.mxu1 %v2647_v6 }
 0x302   :  { %2347 = vmatprep.subr.mxu1 %v2567_v1 }
 0x303   :  { %2348 = vmatpush3.msra.mxu1 %v2666_v9 }
 0x304   :  { %2363 = vmatprep.subr.mxu1 %v2567_v1 }
 0x3b4   :  { %v841_v47 = vpop.f32.mrf.mxu1  ;;  %v911_v48 = vpop.f32.mrf.mxu0 }
 0x3b5   :  { %v987_v49 = vadd.f32 %v2036_v46, %v841_v47  ;;  %v996_v54 = vadd.f32 %v2038_v53, %v911_v48 }
 0x3b6   :  { %v2307_v50 = vpop.f32.mrf.mxu1  ;;  %v2318_v51 = vpop.f32.mrf.mxu0 }
 0x3b7   :  { %v2037_v52 = vmul.f32 -1.442695, %v987_v49  ;;  %v2039_v57 = vmul.f32 -1.442695, %v996_v54  ;;  %v2054_v50 = vld [vmem:[%s3064_s0 + $0xa] sm:$0x3] }
 0x3b9   :  { %2495 = vpow2.f32 %v2037_v52 }
 0x3ba   :  { %2497 = vpow2.f32 %v2039_v57  ;;  %v2056_v57 = vld [vmem:[%s3065_s1 + $0xa] sm:$0x3] }
 0x3bc   :  { %v981_v55 = vpop.f32.mrf.mxu1 }
 0x3bd   :  { %v982_v62 = vadd.f32 %v2742_v29, %v981_v55 }
 0x3be   :  { %v2329_v56 = vpop.f32.mrf.mxu1 }
 0x3c6   :  { %v2496_v58 = vpop.eup %2495 }
 0x3c7   :  { %v991_v59 = vadd.f32 1.0, %v2496_v58  ;;  %v2498_v60 = vpop.eup %2497 }
 0x3c8   :  { %v1000_v61 = vadd.f32 1.0, %v2498_v60 }
 0x3c9   :  { %2499 = vrcp.f32 %v991_v59 }
 0x3ca   :  { %2501 = vrcp.f32 %v1000_v61 }
 0x3d6   :  { %v2500_v63 = vpop.eup %2499 }
 0x3d7   :  { %v1005_v14 = vmul.f32 %v2500_v63, %v982_v62  ;;  %v2502_v16 = vpop.eup %2501 }
 0x3d8   :  { %v1008_v17 = vsub.f32 1.0, %v2502_v16  ;;  %v1010_v20 = vmul.f32 %v2502_v16, %v769_v45 }
 0x3d9   :  { %v1006_v15 = vadd.f32 %v2040_v8, %v1005_v14 }
 0x3db   :  { %2503 = vtanh.f32 %v1006_v15 }
 0x3e8   :  { %v2504_v18 = vpop.eup %2503 }
 0x3e9   :  { %v1009_v19 = vmul.f32 %v2504_v18, %v1008_v17  ;;  %v2058_v17 = vld [vmem:[%s3066_s2 + $0xa] sm:$0x3] }
 0x3eb   :  { %v1011_v21 = vadd.f32 %v1010_v20, %v1009_v19 }
 0x3ed   :  { %2339 = vmatmul.mubr.msk.f32.vlgmr.msra.gmra.mxu0 %vm48_vm1, %v1011_v21  ;;  %2350 = vmatmul.mubr.msk.f32.vlgmr.msra.gmra.mxu1 %vm48_vm1, %v1011_v21  ;;  %2041 = vst.msk [vmem:[%s3070_s6 + $0x6] sm:$0x3] %vm286_vm2, %v1011_v21 }
 0x3ee   :  { %2353 = vmatpush3.msra.mxu0 %v2675_v10  ;;  %2360 = vmatprep.mubr.msk.f32.mxu0 %vm2568_vm0, %v2567_v1 }
 0x3ef   :  { %2354 = vmatprep.subr.mxu0 %v2567_v1  ;;  %2364 = vmatpush3.msra.mxu1 %v2613_v0 }
 0x3f0   :  { %2355 = vmatpush3.msra.mxu0 %v2686_v11  ;;  %2365 = vmatprep.subr.mxu1 %v2567_v1 }
 0x3f1   :  { %2356 = vmatprep.subr.mxu0 %v2567_v1  ;;  %2366 = vmatpush3.msra.mxu1 %v2619_v2 }
 0x3f2   :  { %2357 = vmatpush3.msra.mxu0 %v2695_v12  ;;  %2367 = vmatprep.subr.mxu1 %v2567_v1 }
 0x3f3   :  { %2358 = vmatprep.subr.mxu0 %v2567_v1  ;;  %2368 = vmatpush3.msra.mxu1 %v2639_v5 }
 0x3f4   :  { %2359 = vmatpush3.msra.mxu0 %v2705_v13  ;;  %2369 = vmatprep.subr.mxu1 %v2567_v1 }
 0x3f5   :  { %2361 = vmatmul.mubr.msk.f32.vlgmr.msra.gmra.mxu0 %vm48_vm1, %v1011_v21  ;;  %2374 = vmatprep.subr.mxu0 %v2567_v1 }
 0x3f6   :  { %2375 = vmatpush3.msra.mxu0 %v2626_v3  ;;  %2370 = vmatpush3.msra.mxu1 %v2653_v7 }
 0x3f7   :  { %2376 = vmatprep.subr.mxu0 %v2567_v1  ;;  %2371 = vmatprep.mubr.msk.f32.mxu1 %vm2568_vm0, %v2567_v1 }
 0x3f8   :  { %2377 = vmatpush3.msra.mxu0 %v2633_v4  ;;  %2382 = vmatprep.mubr.msk.f32.mxu0 %vm2568_vm0, %v2567_v1 }
 0x3f9   :  { %2378 = vmatprep.subr.mxu0 %v2567_v1  ;;  %2385 = vmatprep.subr.mxu1 %v2567_v1 }
 0x3fa   :  { %2379 = vmatpush3.msra.mxu0 %v2647_v6 }
 0x3fb   :  { %2380 = vmatprep.subr.mxu0 %v2567_v1 }
 0x3fc   :  { %2381 = vmatpush3.msra.mxu0 %v2666_v9 }
 0x3fd   :  { %2396 = vmatprep.subr.mxu0 %v2567_v1 }
 0x4ad   :  { %v1083_v23 = vpop.f32.mrf.mxu0  ;;  %v1153_v24 = vpop.f32.mrf.mxu1 }
 0x4ae   :  { %v1229_v25 = vadd.f32 %v2045_v22, %v1083_v23  ;;  %v1238_v31 = vadd.f32 %v2047_v30, %v1153_v24 }
 0x4af   :  { %v2340_v26 = vpop.f32.mrf.mxu0  ;;  %v2351_v27 = vpop.f32.mrf.mxu1 }
 0x4b0   :  { %v2046_v28 = vmul.f32 -1.442695, %v1229_v25  ;;  %v2048_v34 = vmul.f32 -1.442695, %v1238_v31  ;;  %v2065_v27 = vld [vmem:[%s3065_s1 + $0xc] sm:$0x3] }
 0x4b2   :  { %2505 = vpow2.f32 %v2046_v28 }
 0x4b3   :  { %2507 = vpow2.f32 %v2048_v34 }
 0x4b5   :  { %v1223_v32 = vpop.f32.mrf.mxu0 }
 0x4b6   :  { %v1224_v39 = vadd.f32 %v2742_v29, %v1223_v32 }
 0x4b7   :  { %v2362_v33 = vpop.f32.mrf.mxu0 }
 0x4bf   :  { %v2506_v35 = vpop.eup %2505 }
 0x4c0   :  { %v1233_v36 = vadd.f32 1.0, %v2506_v35  ;;  %v2508_v37 = vpop.eup %2507 }
 0x4c1   :  { %v1242_v38 = vadd.f32 1.0, %v2508_v37  ;;  %v2067_v37 = vld [vmem:[%s3066_s2 + $0xc] sm:$0x3] }
 0x4c2   :  { %2509 = vrcp.f32 %v1233_v36 }
 0x4c3   :  { %2511 = vrcp.f32 %v1242_v38 }
 0x4cf   :  { %v2510_v40 = vpop.eup %2509 }
 0x4d0   :  { %v1247_v42 = vmul.f32 %v2510_v40, %v1224_v39  ;;  %v2512_v44 = vpop.eup %2511 }
 0x4d1   :  { %v1250_v45 = vsub.f32 1.0, %v2512_v44  ;;  %v1252_v48 = vmul.f32 %v2512_v44, %v1011_v21 }
 0x4d2   :  { %v1248_v43 = vadd.f32 %v2049_v41, %v1247_v42 }
 0x4d4   :  { %2513 = vtanh.f32 %v1248_v43 }
 0x4e1   :  { %v2514_v46 = vpop.eup %2513 }
 0x4e2   :  { %v1251_v47 = vmul.f32 %v2514_v46, %v1250_v45 }
 0x4e4   :  { %v1253_v49 = vadd.f32 %v1252_v48, %v1251_v47 }
 0x4e6   :  { %2372 = vmatmul.mubr.msk.f32.vlgmr.msra.gmra.mxu1 %vm48_vm1, %v1253_v49  ;;  %2383 = vmatmul.mubr.msk.f32.vlgmr.msra.gmra.mxu0 %vm48_vm1, %v1253_v49  ;;  %2050 = vst.msk [vmem:[%s3070_s6 + $0x8] sm:$0x3] %vm286_vm2, %v1253_v49 }
 0x4e7   :  { %2386 = vmatpush3.msra.mxu1 %v2675_v10  ;;  %2393 = vmatprep.mubr.msk.f32.mxu1 %vm2568_vm0, %v2567_v1 }
 0x4e8   :  { %2387 = vmatprep.subr.mxu1 %v2567_v1  ;;  %2397 = vmatpush3.msra.mxu0 %v2613_v0 }
 0x4e9   :  { %2388 = vmatpush3.msra.mxu1 %v2686_v11  ;;  %2398 = vmatprep.subr.mxu0 %v2567_v1 }
 0x4ea   :  { %2389 = vmatprep.subr.mxu1 %v2567_v1  ;;  %2399 = vmatpush3.msra.mxu0 %v2619_v2 }
 0x4eb   :  { %2390 = vmatpush3.msra.mxu1 %v2695_v12  ;;  %2400 = vmatprep.subr.mxu0 %v2567_v1 }
 0x4ec   :  { %2391 = vmatprep.subr.mxu1 %v2567_v1  ;;  %2401 = vmatpush3.msra.mxu0 %v2639_v5 }
 0x4ed   :  { %2392 = vmatpush3.msra.mxu1 %v2705_v13  ;;  %2402 = vmatprep.subr.mxu0 %v2567_v1 }
 0x4ee   :  { %2394 = vmatmul.mubr.msk.f32.vlgmr.msra.gmra.mxu1 %vm48_vm1, %v1253_v49  ;;  %2407 = vmatprep.subr.mxu1 %v2567_v1 }
 0x4ef   :  { %2408 = vmatpush3.msra.mxu1 %v2626_v3  ;;  %2403 = vmatpush3.msra.mxu0 %v2653_v7 }
 0x4f0   :  { %2409 = vmatprep.subr.mxu1 %v2567_v1  ;;  %2404 = vmatprep.mubr.msk.f32.mxu0 %vm2568_vm0, %v2567_v1 }
 0x4f1   :  { %2410 = vmatpush3.msra.mxu1 %v2633_v4  ;;  %2415 = vmatprep.mubr.msk.f32.mxu1 %vm2568_vm0, %v2567_v1 }
 0x4f2   :  { %2411 = vmatprep.subr.mxu1 %v2567_v1  ;;  %2418 = vmatprep.subr.mxu0 %v2567_v1 }
 0x4f3   :  { %2412 = vmatpush3.msra.mxu1 %v2647_v6 }
 0x4f4   :  { %2413 = vmatprep.subr.mxu1 %v2567_v1 }
 0x4f5   :  { %2414 = vmatpush3.msra.mxu1 %v2666_v9 }
 0x4f6   :  { %2429 = vmatprep.subr.mxu1 %v2567_v1 }
 0x5a6   :  { %v1325_v51 = vpop.f32.mrf.mxu1  ;;  %v1395_v52 = vpop.f32.mrf.mxu0 }
 0x5a7   :  { %v1471_v53 = vadd.f32 %v2054_v50, %v1325_v51  ;;  %v1480_v58 = vadd.f32 %v2056_v57, %v1395_v52 }
 0x5a8   :  { %v2373_v54 = vpop.f32.mrf.mxu1  ;;  %v2384_v55 = vpop.f32.mrf.mxu0 }
 0x5a9   :  { %v2055_v56 = vmul.f32 -1.442695, %v1471_v53  ;;  %v2057_v61 = vmul.f32 -1.442695, %v1480_v58 }
 0x5ab   :  { %2515 = vpow2.f32 %v2055_v56 }
 0x5ac   :  { %2517 = vpow2.f32 %v2057_v61 }
 0x5ae   :  { %v1465_v59 = vpop.f32.mrf.mxu1 }
 0x5af   :  { %v1466_v15 = vadd.f32 %v2742_v29, %v1465_v59  ;;  %v2076_v59 = vld [vmem:[%s3066_s2 + $0xe] sm:$0x3] }
 0x5b0   :  { %v2395_v60 = vpop.f32.mrf.mxu1 }
 0x5b8   :  { %v2516_v62 = vpop.eup %2515 }
 0x5b9   :  { %v1475_v63 = vadd.f32 1.0, %v2516_v62  ;;  %v2518_v8 = vpop.eup %2517 }
 0x5ba   :  { %v1484_v14 = vadd.f32 1.0, %v2518_v8 }
 0x5bb   :  { %2519 = vrcp.f32 %v1475_v63 }
 0x5bc   :  { %2521 = vrcp.f32 %v1484_v14 }
 0x5c8   :  { %v2520_v16 = vpop.eup %2519 }
 0x5c9   :  { %v1489_v18 = vmul.f32 %v2520_v16, %v1466_v15  ;;  %v2522_v20 = vpop.eup %2521 }
 0x5ca   :  { %v1492_v21 = vsub.f32 1.0, %v2522_v20  ;;  %v1494_v24 = vmul.f32 %v2522_v20, %v1253_v49 }
 0x5cb   :  { %v1490_v19 = vadd.f32 %v2058_v17, %v1489_v18 }
 0x5cd   :  { %2523 = vtanh.f32 %v1490_v19 }
 0x5da   :  { %v2524_v22 = vpop.eup %2523 }
 0x5db   :  { %v1493_v23 = vmul.f32 %v2524_v22, %v1492_v21 }
 0x5dd   :  { %v1495_v25 = vadd.f32 %v1494_v24, %v1493_v23 }
 0x5df   :  { %2405 = vmatmul.mubr.msk.f32.vlgmr.msra.gmra.mxu0 %vm48_vm1, %v1495_v25  ;;  %2416 = vmatmul.mubr.msk.f32.vlgmr.msra.gmra.mxu1 %vm48_vm1, %v1495_v25  ;;  %2059 = vst.msk [vmem:[%s3070_s6 + $0xa] sm:$0x3] %vm286_vm2, %v1495_v25 }
 0x5e0   :  { %2419 = vmatpush3.msra.mxu0 %v2675_v10  ;;  %2426 = vmatprep.mubr.msk.f32.mxu0 %vm2568_vm0, %v2567_v1 }
 0x5e1   :  { %2420 = vmatprep.subr.mxu0 %v2567_v1  ;;  %2430 = vmatpush3.msra.mxu1 %v2613_v0  ;;  %v2063_v0 = vld [vmem:[%s3064_s0 + $0xc] sm:$0x3] }
 0x5e2   :  { %2421 = vmatpush3.msra.mxu0 %v2686_v11  ;;  %2431 = vmatprep.subr.mxu1 %v2567_v1 }
 0x5e3   :  { %2422 = vmatprep.subr.mxu0 %v2567_v1  ;;  %2432 = vmatpush3.msra.mxu1 %v2619_v2 }
 0x5e4   :  { %2423 = vmatpush3.msra.mxu0 %v2695_v12  ;;  %2433 = vmatprep.subr.mxu1 %v2567_v1 }
 0x5e5   :  { %2424 = vmatprep.subr.mxu0 %v2567_v1  ;;  %2434 = vmatpush3.msra.mxu1 %v2639_v5 }
 0x5e6   :  { %2425 = vmatpush3.msra.mxu0 %v2705_v13  ;;  %2435 = vmatprep.subr.mxu1 %v2567_v1 }
 0x5e7   :  { %2427 = vmatmul.mubr.msk.f32.vlgmr.msra.gmra.mxu0 %vm48_vm1, %v1495_v25  ;;  %2440 = vmatprep.subr.mxu0 %v2567_v1 }
 0x5e8   :  { %2441 = vmatpush3.msra.mxu0 %v2626_v3  ;;  %2436 = vmatpush3.msra.mxu1 %v2653_v7 }
 0x5e9   :  { %2442 = vmatprep.subr.mxu0 %v2567_v1  ;;  %2437 = vmatprep.mubr.msk.f32.mxu1 %vm2568_vm0, %v2567_v1 }
 0x5ea   :  { %2443 = vmatpush3.msra.mxu0 %v2633_v4  ;;  %2448 = vmatprep.mubr.msk.f32.mxu0 %vm2568_vm0, %v2567_v1 }
 0x5eb   :  { %2444 = vmatprep.subr.mxu0 %v2567_v1  ;;  %2451 = vmatprep.subr.mxu1 %v2567_v1 }
 0x5ec   :  { %2445 = vmatpush3.msra.mxu0 %v2647_v6 }
 0x5ed   :  { %2446 = vmatprep.subr.mxu0 %v2567_v1 }
 0x5ee   :  { %2447 = vmatpush3.msra.mxu0 %v2666_v9 }
 0x69f   :  { %v1567_v2 = vpop.f32.mrf.mxu0  ;;  %v1637_v3 = vpop.f32.mrf.mxu1 }
 0x6a0   :  { %v1713_v4 = vadd.f32 %v2063_v0, %v1567_v2  ;;  %v1722_v6 = vadd.f32 %v2065_v27, %v1637_v3 }
 0x6a1   :  { %v2406_v5 = vpop.f32.mrf.mxu0  ;;  %v2417_v7 = vpop.f32.mrf.mxu1 }
 0x6a2   :  { %v2064_v26 = vmul.f32 -1.442695, %v1713_v4  ;;  %v2066_v31 = vmul.f32 -1.442695, %v1722_v6 }
 0x6a4   :  { %2525 = vpow2.f32 %v2064_v26 }
 0x6a5   :  { %2527 = vpow2.f32 %v2066_v31 }
 0x6a7   :  { %v1707_v28 = vpop.f32.mrf.mxu0 }
 0x6a8   :  { %v1708_v35 = vadd.f32 %v2742_v29, %v1707_v28 }
 0x6a9   :  { %v2428_v30 = vpop.f32.mrf.mxu0 }
 0x6b1   :  { %v2526_v9 = vpop.eup %2525 }
 0x6b2   :  { %v1717_v32 = vadd.f32 1.0, %v2526_v9  ;;  %v2528_v33 = vpop.eup %2527 }
 0x6b3   :  { %v1726_v34 = vadd.f32 1.0, %v2528_v33 }
 0x6b4   :  { %2529 = vrcp.f32 %v1717_v32 }
 0x6b5   :  { %2531 = vrcp.f32 %v1726_v34 }
 0x6c1   :  { %v2530_v36 = vpop.eup %2529 }
 0x6c2   :  { %v1731_v38 = vmul.f32 %v2530_v36, %v1708_v35  ;;  %v2532_v40 = vpop.eup %2531 }
 0x6c3   :  { %v1734_v41 = vsub.f32 1.0, %v2532_v40  ;;  %v1736_v44 = vmul.f32 %v2532_v40, %v1495_v25 }
 0x6c4   :  { %v1732_v39 = vadd.f32 %v2067_v37, %v1731_v38 }
 0x6c6   :  { %2533 = vtanh.f32 %v1732_v39 }
 0x6d3   :  { %v2534_v42 = vpop.eup %2533 }
 0x6d4   :  { %v1735_v43 = vmul.f32 %v2534_v42, %v1734_v41 }
 0x6d6   :  { %v1737_v45 = vadd.f32 %v1736_v44, %v1735_v43 }
 0x6d8   :  { %2438 = vmatmul.mubr.msk.f32.vlgmr.msra.gmra.mxu1 %vm48_vm1, %v1737_v45  ;;  %2449 = vmatmul.mubr.msk.f32.vlgmr.msra.gmra.mxu0 %vm48_vm1, %v1737_v45  ;;  %2068 = vst.msk [vmem:[%s3070_s6 + $0xc] sm:$0x3] %vm286_vm2, %v1737_v45 }
 0x6d9   :  { %2452 = vmatpush3.msra.mxu1 %v2675_v10  ;;  %2459 = vmatprep.mubr.msk.f32.mxu1 %vm2568_vm0, %v2567_v1  ;;  %v2072_v10 = vld [vmem:[%s3064_s0 + $0xe] sm:$0x3] }
 0x6da   :  { %2453 = vmatprep.subr.mxu1 %v2567_v1 }
 0x6db   :  { %2454 = vmatpush3.msra.mxu1 %v2686_v11 }
 0x6dc   :  { %2455 = vmatprep.subr.mxu1 %v2567_v1 }
 0x6dd   :  { %2456 = vmatpush3.msra.mxu1 %v2695_v12  ;;  %v2074_v12 = vld [vmem:[%s3065_s1 + $0xe] sm:$0x3]  ;;  %s2569_s1 = smov [#allocation2]  }
 0x6de   :  { %2457 = vmatprep.subr.mxu1 %v2567_v1  ;;  %s1991_s12 = sshll.u32 %s2569_s1, 4  ;;  %s1992_s12 = int_to_ptr.vmem [resolvable:$true] %s1991_s12 }
 0x6df   :  { %2458 = vmatpush3.msra.mxu1 %v2705_v13  ;;  %s2545_s2 = scalar_lea.vmem %s1992_s12, 32  ;;  %p2550_p1 = scmp.lt.s32.totalorder %s1992_s12, %s1992_s12 }
 0x6e0   :  { %2460 = vmatmul.mubr.msk.f32.vlgmr.msra.gmra.mxu1 %vm48_vm1, %v1737_v45  ;;  %p2546_p0 = scmp.ne.s32.totalorder %s1992_s12, %s2545_s2  ;;  %p2551_p2 = scmp.lt.s32.totalorder %s2545_s2, %s2545_s2 }
 0x6e2   :  { %p2552_p3 = por %p2551_p2, %p2550_p1 }
 0x6e4   :  { %p2553_p4 = pnand %p2552_p3, %p2546_p0 }
 0x798   :  { %v1809_v46 = vpop.f32.mrf.mxu1  ;;  %v1879_v47 = vpop.f32.mrf.mxu0 }
 0x799   :  { %v1955_v48 = vadd.f32 %v2072_v10, %v1809_v46  ;;  %v1964_v1 = vadd.f32 %v2074_v12, %v1879_v47 }
 0x79a   :  { %v2439_v49 = vpop.f32.mrf.mxu1  ;;  %v2450_v50 = vpop.f32.mrf.mxu0 }
 0x79b   :  { %v2073_v11 = vmul.f32 -1.442695, %v1955_v48  ;;  %v2075_v52 = vmul.f32 -1.442695, %v1964_v1 }
 0x79d   :  { %2535 = vpow2.f32 %v2073_v11 }
 0x79e   :  { %2537 = vpow2.f32 %v2075_v52 }
 0x7a0   :  { %v1949_v51 = vpop.f32.mrf.mxu1 }
 0x7a1   :  { %v1950_v57 = vadd.f32 %v2742_v29, %v1949_v51 }
 0x7a2   :  { %v2461_v13 = vpop.f32.mrf.mxu1 }
 0x7aa   :  { %v2536_v53 = vpop.eup %2535 }
 0x7ab   :  { %v1959_v54 = vadd.f32 1.0, %v2536_v53  ;;  %v2538_v55 = vpop.eup %2537 }
 0x7ac   :  { %v1968_v56 = vadd.f32 1.0, %v2538_v55 }
 0x7ad   :  { %2539 = vrcp.f32 %v1959_v54 }
 0x7ae   :  { %2541 = vrcp.f32 %v1968_v56 }
 0x7ba   :  { %v2540_v58 = vpop.eup %2539 }
 0x7bb   :  { %v1973_v60 = vmul.f32 %v2540_v58, %v1950_v57  ;;  %v2542_v62 = vpop.eup %2541 }
 0x7bc   :  { %v1976_v63 = vsub.f32 1.0, %v2542_v62  ;;  %v1978_v15 = vmul.f32 %v2542_v62, %v1737_v45 }
 0x7bd   :  { %v1974_v61 = vadd.f32 %v2076_v59, %v1973_v60 }
 0x7bf   :  { %2543 = vtanh.f32 %v1974_v61 }
 0x7cc   :  { %v2544_v8 = vpop.eup %2543 }
 0x7cd   :  { %v1977_v14 = vmul.f32 %v2544_v8, %v1976_v63 }
 0x7cf   :  { %v1979_v16 = vadd.f32 %v1978_v15, %v1977_v14 }
 0x7d1   :  { %2077 = vst.msk [vmem:[%s3070_s6 + $0xe] sm:$0x3] %vm286_vm2, %v1979_v16  ;;  %1982 = vst.msk [vmem:[#allocation2] sm:$0x3] %vm286_vm2, %v1979_v16 }
 0x7d2   :  { %2556 = shalt.err (!%p2553_p4)
}
 0x7d3   :  { %1994 = dma.vmem_to_hbm [thread:$0]  %s1992_s12, 32, %s3071_s7, [#allocation3]  }
 0x7d4   :  { %2565 = dma.done.wait [#allocation3], 32  }
 0x7d5   :  { %2566 = vsyncadd [#allocation3], 4294967264 }
 0x7d6   :  { %2000 = vsyncpa [#allocation3], 1 }

</bundles_post_ra>
